<compile_context>
chip_gen: v7x
topology: tpu7x:2x2x1
jax: 0.10.0
libtpu: 0.0.40
codegen_flags: <defaults>
</compile_context>

<pallas_src>
import jax
import jax.numpy as jnp
from jax import lax
from jax.experimental import pallas as pl
from jax.experimental.pallas import tpu as pltpu

# ---- sizes (small, consistent with the module's forward; batch=1 is squeezed) ----
VOCAB = 50      # args.embed_num
EMBED = 32      # args.embed_dim
HIDDEN = 32     # args.hidden_size
ATT = 32        # args.attention_size
LABELS = 3      # args.label_num
SEQ = 8         # sequence length
MAX_NORM = 5.0  # args.max_norm

LANES = 4 * HIDDEN                 # 128 — fused-gate width, also >= 3*ATT, HIDDEN, LABELS
assert LANES == 128 and 3 * ATT <= LANES

# Row offsets inside the packed (SLAB_ROWS, 128) weight slab.
R_WIN = 0                          # (EMBED, 4H)   fused input->gates weights
R_WHH = R_WIN + EMBED              # (HIDDEN, 4H)  fused hidden->gates weights
R_WH = R_WHH + HIDDEN              # (HIDDEN, 3*ATT pad 128) attention Wh (full|left|right)
R_WQ = R_WH + HIDDEN               # (HIDDEN, 3*ATT pad 128) attention Wq
R_VSEL = R_WQ + HIDDEN             # (128, 128) block-diag scoring selector (cols 0:3 valid)
R_W1 = R_VSEL + LANES              # (HIDDEN, HIDDEN pad 128) self.w1
R_W2 = R_W1 + HIDDEN               # self.w2
R_W3 = R_W2 + HIDDEN               # self.w3
R_WL2 = R_W3 + HIDDEN              # (HIDDEN, LABELS pad 128) linear_2.weight.T
SLAB_ROWS = R_WL2 + HIDDEN         # 384


# ========================= fused kernel =========================
def fused_kernel(sc_ref, emb_ref, mat_ref, vec_ref, out_ref):
    start = sc_ref[0]
    end = sc_ref[1]

    # ---- embedding gather (tokens from SMEM scalar prefetch) + max_norm renorm ----
    rows = [emb_ref[pl.ds(sc_ref[2 + t], 1), :] for t in range(SEQ)]   # SEQ x (1, EMBED)
    x_emb = jnp.concatenate(rows, axis=0)                              # (SEQ, EMBED)
    nrm = jnp.sqrt(jnp.sum(x_emb * x_emb, axis=1, keepdims=True))
    x_emb = x_emb * jnp.minimum(1.0, MAX_NORM / jnp.maximum(nrm, 1e-12))
    # dropout (self.dropout) is eval-mode identity.

    # ---- LSTM: hoisted input projection + fused 4-gate matmul, unrolled over SEQ ----
    w_in = mat_ref[R_WIN:R_WIN + EMBED, :]                             # (32, 128)
    w_hh = mat_ref[R_WHH:R_WHH + HIDDEN, :]                            # (32, 128)
    xw = jnp.dot(x_emb, w_in, preferred_element_type=jnp.float32) + vec_ref[0:1, :]  # (SEQ, 128)

    h = jnp.zeros((1, HIDDEN), jnp.float32)
    c = jnp.zeros((1, HIDDEN), jnp.float32)
    hs = []
    for t in range(SEQ):                                               # static unroll (SEQ=8)
        g = xw[t:t + 1, :] + jnp.dot(h, w_hh, preferred_element_type=jnp.float32)  # (1, 128)
        i_g = jax.nn.sigmoid(g[:, 0:HIDDEN])
        f_g = jax.nn.sigmoid(g[:, HIDDEN:2 * HIDDEN])
        g_g = jnp.tanh(g[:, 2 * HIDDEN:3 * HIDDEN])
        o_g = jax.nn.sigmoid(g[:, 3 * HIDDEN:4 * HIDDEN])
        c = f_g * c + i_g * g_g
        h = o_g * jnp.tanh(c)
        hs.append(h)
    h_seq = jnp.concatenate(hs, axis=0)                                # (SEQ, HIDDEN), stays in vregs

    # ---- average target hidden state ----
    idx = lax.broadcasted_iota(jnp.int32, (SEQ, 1), 0)
    tgt_mask = jnp.logical_and(idx >= start, idx <= end)
    n_tgt = (end - start + 1).astype(jnp.float32)
    avg_t = jnp.sum(jnp.where(tgt_mask, h_seq, 0.0), axis=0, keepdims=True) / n_tgt   # (1, H)

    # ---- three additive attentions, batched into lane-dense matmuls ----
    proj = jnp.tanh(
        jnp.dot(h_seq, mat_ref[R_WH:R_WH + HIDDEN, :], preferred_element_type=jnp.float32)
        + jnp.dot(avg_t, mat_ref[R_WQ:R_WQ + HIDDEN, :], preferred_element_type=jnp.float32))  # (SEQ,128)
    scores = jnp.dot(proj, mat_ref[R_VSEL:R_VSEL + LANES, :],
                     preferred_element_type=jnp.float32)[:, 0:3]                               # (SEQ, 3)

    # masks: col 0 = full sequence, col 1 = left context, col 2 = right context
    row = lax.broadcasted_iota(jnp.int32, (SEQ, 3), 0)
    col = lax.broadcasted_iota(jnp.int32, (SEQ, 3), 1)
    mask = (col == 0) | ((col == 1) & (row < start)) | ((col == 2) & (row > end))

    sm = jnp.where(mask, scores, -1e30)
    m = jnp.max(sm, axis=0, keepdims=True)
    e = jnp.where(mask, jnp.exp(sm - m), 0.0)
    denom = jnp.maximum(jnp.sum(e, axis=0, keepdims=True), 1e-30)
    alpha = e * pl.reciprocal(denom, approx=True)       # (SEQ, 3); empty subsets -> exactly 0

    def ctx(k):                                          # weighted row sum for attention k
        return jnp.sum(alpha[:, k:k + 1] * h_seq, axis=0, keepdims=True)   # (1, H)

    # ---- combine (w1/w2/w3 + bia) and linear_2; empty left/right give exact-zero contributions ----
    res = (jnp.dot(ctx(0), mat_ref[R_W1:R_W1 + HIDDEN, :], preferred_element_type=jnp.float32)
           + jnp.dot(ctx(1), mat_ref[R_W2:R_W2 + HIDDEN, :], preferred_element_type=jnp.float32)
           + jnp.dot(ctx(2), mat_ref[R_W3:R_W3 + HIDDEN, :], preferred_element_type=jnp.float32)
           + vec_ref[1:2, :])                                                   # (1, 128), cols 32: zero
    logits = jnp.dot(res[:, 0:HIDDEN], mat_ref[R_WL2:R_WL2 + HIDDEN, :],
                     preferred_element_type=jnp.float32) + vec_ref[2:3, :]      # (1, 128), cols 3: zero
    out_ref[...] = logits[:, 0:LABELS]


def attention_context_forward(scalars, emb_w, mat_slab, vec_slab):
    return pl.pallas_call(
        fused_kernel,
        out_shape=jax.ShapeDtypeStruct((1, LABELS), jnp.float32),
        grid_spec=pltpu.PrefetchScalarGridSpec(
            num_scalar_prefetch=1,
            grid=(1,),
            in_specs=[
                pl.BlockSpec((VOCAB, EMBED), lambda i, sc: (0, 0)),
                pl.BlockSpec((SLAB_ROWS, LANES), lambda i, sc: (0, 0)),
                pl.BlockSpec((8, LANES), lambda i, sc: (0, 0)),
            ],
            out_specs=pl.BlockSpec((1, LABELS), lambda i, sc: (0, 0)),
        ),
        compiler_params=pltpu.CompilerParams(dimension_semantics=("arbitrary",)),
    )(scalars, emb_w, mat_slab, vec_slab)


# ===================== host-side weight packing =====================
def pack_weights(wih, whh, b, wh, wq, v, w123, bia, wl2T, bl2):
    def pad_cols(x):
        return jnp.pad(x, ((0, 0), (0, LANES - x.shape[1])))

    w_in = jnp.concatenate([wih[k] for k in range(4)], axis=1)      # (EMBED, 4H)
    w_hh = jnp.concatenate([whh[k] for k in range(4)], axis=1)      # (HIDDEN, 4H)
    b_g = jnp.concatenate([b[k] for k in range(4)], axis=1)         # (1, 4H)

    wh_cat = pad_cols(jnp.concatenate([wh[k] for k in range(3)], axis=1))   # (HIDDEN, 128)
    wq_cat = pad_cols(jnp.concatenate([wq[k] for k in range(3)], axis=1))   # (HIDDEN, 128)

    vsel = jnp.zeros((LANES, LANES), jnp.float32)                    # block-diag scoring selector
    for k in range(3):
        vsel = vsel.at[k * ATT:(k + 1) * ATT, k].set(v[k, 0, :])

    w1p = pad_cols(w123[0]); w2p = pad_cols(w123[1]); w3p = pad_cols(w123[2])
    wl2p = pad_cols(wl2T)

    mat_slab = jnp.concatenate([w_in, w_hh, wh_cat, wq_cat, vsel, w1p, w2p, w3p, wl2p], axis=0)
    assert mat_slab.shape == (SLAB_ROWS, LANES)

    vec_slab = jnp.zeros((8, LANES), jnp.float32)
    vec_slab = vec_slab.at[0, :].set(b_g[0])            # fused gate bias (= b_ih + b_hh)
    vec_slab = vec_slab.at[1, :HIDDEN].set(bia[0])      # self.bia
    vec_slab = vec_slab.at[2, :LABELS].set(bl2[0])      # linear_2.bias
    return mat_slab, vec_slab


# ===================== pure-JAX reference (module semantics) =====================
def reference_forward(tokens, start, end, emb_w, wih, whh, b, wh, wq, v, w123, bia, wl2T, bl2):
    rows = emb_w[tokens]
    nrm = jnp.linalg.norm(rows, axis=-1, keepdims=True)
    x_emb = rows * jnp.minimum(1.0, MAX_NORM / jnp.maximum(nrm, 1e-12))

    h = jnp.zeros((1, HIDDEN), jnp.float32)
    c = jnp.zeros((1, HIDDEN), jnp.float32)
    hs = []
    for t in range(SEQ):
        x_t = x_emb[t:t + 1]
        gi = jax.nn.sigmoid(x_t @ wih[0] + h @ whh[0] + b[0])
        gf = jax.nn.sigmoid(x_t @ wih[1] + h @ whh[1] + b[1])
        gg = jnp.tanh(x_t @ wih[2] + h @ whh[2] + b[2])
        go = jax.nn.sigmoid(x_t @ wih[3] + h @ whh[3] + b[3])
        c = gf * c + gi * gg
        h = go * jnp.tanh(c)
        hs.append(h)
    h_seq = jnp.concatenate(hs, axis=0)

    target = h_seq[start:end + 1]
    avg_t = jnp.sum(target, axis=0, keepdims=True) / float(end - start + 1)

    def att(k, sub):
        proj = jnp.tanh(sub @ wh[k] + avg_t @ wq[k])
        sc = jnp.sum(proj * v[k], axis=1, keepdims=True)
        al = jax.nn.softmax(sc, axis=0)
        return jnp.sum(al * sub, axis=0, keepdims=True)

    res = att(0, h_seq) @ w123[0]
    if start > 0:
        res = res + att(1, h_seq[:start]) @ w123[1]
    if end < SEQ - 1:
        res = res + att(2, h_seq[end + 1:]) @ w123[2]
    res = res + bia
    return res @ wl2T + bl2


if __name__ == "__main__":
    key = jax.random.PRNGKey(0)
    ks = jax.random.split(key, 12)

    emb_w = jax.random.normal(ks[0], (VOCAB, EMBED), jnp.float32) * 0.5
    wih = jax.random.normal(ks[1], (4, EMBED, HIDDEN), jnp.float32) * 0.1     # gate order i,f,g,o
    whh = jax.random.normal(ks[2], (4, HIDDEN, HIDDEN), jnp.float32) * 0.1
    b = jax.random.normal(ks[3], (4, 1, HIDDEN), jnp.float32) * 0.1
    wh = jax.random.normal(ks[4], (3, HIDDEN, ATT), jnp.float32) * 0.1        # Att Wh (full, left, right)
    wq = jax.random.normal(ks[5], (3, HIDDEN, ATT), jnp.float32) * 0.1        # Att Wq
    v = jax.random.normal(ks[6], (3, 1, ATT), jnp.float32) * 0.1              # Att scoring vector
    w123 = jax.random.normal(ks[7], (3, HIDDEN, HIDDEN), jnp.float32) * 0.1   # self.w1/w2/w3
    bia = jax.random.normal(ks[8], (1, HIDDEN), jnp.float32) * 0.1
    wl2T = jax.random.normal(ks[9], (HIDDEN, LABELS), jnp.float32) * 0.1      # linear_2.weight.T
    bl2 = jax.random.normal(ks[10], (1, LABELS), jnp.float32) * 0.1
    tokens = jax.random.randint(ks[11], (SEQ,), 0, VOCAB).astype(jnp.int32)   # x (batch=1 squeezed)

    mat_slab, vec_slab = pack_weights(wih, whh, b, wh, wq, v, w123, bia, wl2T, bl2)
    fwd = jax.jit(attention_context_forward)

    # (2,4): both left & right contexts active; (0, SEQ-1): both omitted (edge case).
    for (start, end) in [(2, 4), (0, SEQ - 1)]:
        scalars = jnp.concatenate([jnp.array([start, end], jnp.int32), tokens])
        out = jax.block_until_ready(fwd(scalars, emb_w, mat_slab, vec_slab))
        ref = reference_forward(tokens, start, end, emb_w, wih, whh, b, wh, wq, v,
                                w123, bia, wl2T, bl2)
        assert out.shape == (1, LABELS)
        assert jnp.allclose(out, ref, atol=5e-3, rtol=5e-3), (start, end, out, ref)

    print("KERNEL_OK")
</pallas_src>

<mosaic_0001>
module attributes {stable_mosaic.version = 11 : i64} {
  func.func @fused_kernel(%arg0: i32, %arg1: memref<10xi32, #tpu.memory_space<smem>>, %arg2: memref<50x32xf32, #tpu.memory_space<vmem>>, %arg3: memref<384x128xf32, #tpu.memory_space<vmem>>, %arg4: memref<8x128xf32, #tpu.memory_space<vmem>>, %arg5: memref<1x3xf32, #tpu.memory_space<vmem>>) attributes {dimension_semantics = [#tpu.dimension_semantics<arbitrary>], iteration_bounds = array<i64: 1>, scalar_prefetch = 1 : i64, scratch_operands = 0 : i64, tpu.core_type = #tpu.core_type<tc>, window_params = [{pipeline_mode = #tpu.pipeline_mode<synchronous>, transform_indices = @transform_0, window_bounds = array<i64: 50, 32>}, {pipeline_mode = #tpu.pipeline_mode<synchronous>, transform_indices = @transform_1, window_bounds = array<i64: 384, 128>}, {pipeline_mode = #tpu.pipeline_mode<synchronous>, transform_indices = @transform_2, window_bounds = array<i64: 8, 128>}, {pipeline_mode = #tpu.pipeline_mode<synchronous>, transform_indices = @transform_3, window_bounds = array<i64: 1, 3>}]} {
    %c0 = arith.constant 0 : index
    %0 = memref.load %arg1[%c0] : memref<10xi32, #tpu.memory_space<smem>>
    %c1 = arith.constant 1 : index
    %1 = memref.load %arg1[%c1] : memref<10xi32, #tpu.memory_space<smem>>
    %c2 = arith.constant 2 : index
    %2 = memref.load %arg1[%c2] : memref<10xi32, #tpu.memory_space<smem>>
    %3 = arith.index_cast %2 : i32 to index
    %c0_0 = arith.constant 0 : index
    %4 = vector.load %arg2[%3, %c0_0] : memref<50x32xf32, #tpu.memory_space<vmem>>, vector<1x32xf32>
    %c3 = arith.constant 3 : index
    %5 = memref.load %arg1[%c3] : memref<10xi32, #tpu.memory_space<smem>>
    %6 = arith.index_cast %5 : i32 to index
    %c0_1 = arith.constant 0 : index
    %7 = vector.load %arg2[%6, %c0_1] : memref<50x32xf32, #tpu.memory_space<vmem>>, vector<1x32xf32>
    %c4 = arith.constant 4 : index
    %8 = memref.load %arg1[%c4] : memref<10xi32, #tpu.memory_space<smem>>
    %9 = arith.index_cast %8 : i32 to index
    %c0_2 = arith.constant 0 : index
    %10 = vector.load %arg2[%9, %c0_2] : memref<50x32xf32, #tpu.memory_space<vmem>>, vector<1x32xf32>
    %c5 = arith.constant 5 : index
    %11 = memref.load %arg1[%c5] : memref<10xi32, #tpu.memory_space<smem>>
    %12 = arith.index_cast %11 : i32 to index
    %c0_3 = arith.constant 0 : index
    %13 = vector.load %arg2[%12, %c0_3] : memref<50x32xf32, #tpu.memory_space<vmem>>, vector<1x32xf32>
    %c6 = arith.constant 6 : index
    %14 = memref.load %arg1[%c6] : memref<10xi32, #tpu.memory_space<smem>>
    %15 = arith.index_cast %14 : i32 to index
    %c0_4 = arith.constant 0 : index
    %16 = vector.load %arg2[%15, %c0_4] : memref<50x32xf32, #tpu.memory_space<vmem>>, vector<1x32xf32>
    %c7 = arith.constant 7 : index
    %17 = memref.load %arg1[%c7] : memref<10xi32, #tpu.memory_space<smem>>
    %18 = arith.index_cast %17 : i32 to index
    %c0_5 = arith.constant 0 : index
    %19 = vector.load %arg2[%18, %c0_5] : memref<50x32xf32, #tpu.memory_space<vmem>>, vector<1x32xf32>
    %c8 = arith.constant 8 : index
    %20 = memref.load %arg1[%c8] : memref<10xi32, #tpu.memory_space<smem>>
    %21 = arith.index_cast %20 : i32 to index
    %c0_6 = arith.constant 0 : index
    %22 = vector.load %arg2[%21, %c0_6] : memref<50x32xf32, #tpu.memory_space<vmem>>, vector<1x32xf32>
    %c9 = arith.constant 9 : index
    %23 = memref.load %arg1[%c9] : memref<10xi32, #tpu.memory_space<smem>>
    %24 = arith.index_cast %23 : i32 to index
    %c0_7 = arith.constant 0 : index
    %25 = vector.load %arg2[%24, %c0_7] : memref<50x32xf32, #tpu.memory_space<vmem>>, vector<1x32xf32>
    %26 = tpu.concatenate %4, %7, %10, %13, %16, %19, %22, %25 in 0 : vector<1x32xf32>, vector<1x32xf32>, vector<1x32xf32>, vector<1x32xf32>, vector<1x32xf32>, vector<1x32xf32>, vector<1x32xf32>, vector<1x32xf32> -> vector<8x32xf32>
    %27 = arith.mulf %26, %26 : vector<8x32xf32>
    %cst = arith.constant dense<0.000000e+00> : vector<8xf32>
    %28 = vector.multi_reduction <add>, %27, %cst [1] : vector<8x32xf32> to vector<8xf32>
    %29 = vector.shape_cast %28 : vector<8xf32> to vector<8x1xf32>
    %30 = math.sqrt %29 : vector<8x1xf32>
    %cst_8 = arith.constant 9.99999996E-13 : f32
    %31 = vector.broadcast %cst_8 : f32 to vector<8x1xf32>
    %32 = arith.maximumf %30, %31 : vector<8x1xf32>
    %cst_9 = arith.constant 5.000000e+00 : f32
    %33 = vector.broadcast %cst_9 : f32 to vector<8x1xf32>
    %34 = arith.divf %33, %32 : vector<8x1xf32>
    %cst_10 = arith.constant 1.000000e+00 : f32
    %35 = vector.broadcast %cst_10 : f32 to vector<8x1xf32>
    %36 = arith.minimumf %35, %34 : vector<8x1xf32>
    %37 = vector.broadcast %36 : vector<8x1xf32> to vector<8x32xf32>
    %38 = arith.mulf %26, %37 : vector<8x32xf32>
    %c0_11 = arith.constant 0 : index
    %c0_12 = arith.constant 0 : index
    %39 = vector.load %arg3[%c0_11, %c0_12] : memref<384x128xf32, #tpu.memory_space<vmem>>, vector<32x128xf32>
    %c32 = arith.constant 32 : index
    %c0_13 = arith.constant 0 : index
    %40 = vector.load %arg3[%c32, %c0_13] : memref<384x128xf32, #tpu.memory_space<vmem>>, vector<32x128xf32>
    %cst_14 = arith.constant dense<0.000000e+00> : vector<8x128xf32>
    %41 = tpu.matmul %38, %39, %cst_14 {dimension_numbers = #tpu.dot_dimension_numbers<[1], [0], [0], [1], [0, 0, 1, 1], [], []>} : vector<8x32xf32>, vector<32x128xf32>, vector<8x128xf32> -> vector<8x128xf32>
    %c0_15 = arith.constant 0 : index
    %c0_16 = arith.constant 0 : index
    %42 = vector.load %arg4[%c0_15, %c0_16] : memref<8x128xf32, #tpu.memory_space<vmem>>, vector<1x128xf32>
    %43 = vector.broadcast %42 : vector<1x128xf32> to vector<8x128xf32>
    %44 = arith.addf %41, %43 : vector<8x128xf32>
    %cst_17 = arith.constant 0.000000e+00 : f32
    %45 = vector.broadcast %cst_17 : f32 to vector<1x32xf32>
    %cst_18 = arith.constant 0.000000e+00 : f32
    %46 = vector.broadcast %cst_18 : f32 to vector<1x32xf32>
    %47 = vector.extract_strided_slice %44 {offsets = [0, 0], sizes = [1, 128], strides = [1, 1]} : vector<8x128xf32> to vector<1x128xf32>
    %cst_19 = arith.constant dense<0.000000e+00> : vector<1x128xf32>
    %48 = tpu.matmul %45, %40, %cst_19 {dimension_numbers = #tpu.dot_dimension_numbers<[1], [0], [0], [1], [0, 0, 1, 1], [], []>} : vector<1x32xf32>, vector<32x128xf32>, vector<1x128xf32> -> vector<1x128xf32>
    %49 = arith.addf %47, %48 : vector<1x128xf32>
    %50 = vector.extract_strided_slice %49 {offsets = [0, 0], sizes = [1, 32], strides = [1, 1]} : vector<1x128xf32> to vector<1x32xf32>
    %51 = arith.negf %50 : vector<1x32xf32>
    %52 = math.exp %51 : vector<1x32xf32>
    %cst_20 = arith.constant 1.000000e+00 : f32
    %53 = vector.broadcast %cst_20 : f32 to vector<1x32xf32>
    %54 = arith.addf %53, %52 : vector<1x32xf32>
    %55 = arith.divf %53, %54 : vector<1x32xf32>
    %56 = vector.extract_strided_slice %49 {offsets = [0, 32], sizes = [1, 32], strides = [1, 1]} : vector<1x128xf32> to vector<1x32xf32>
    %57 = arith.negf %56 : vector<1x32xf32>
    %58 = math.exp %57 : vector<1x32xf32>
    %cst_21 = arith.constant 1.000000e+00 : f32
    %59 = vector.broadcast %cst_21 : f32 to vector<1x32xf32>
    %60 = arith.addf %59, %58 : vector<1x32xf32>
    %61 = arith.divf %59, %60 : vector<1x32xf32>
    %62 = vector.extract_strided_slice %49 {offsets = [0, 64], sizes = [1, 32], strides = [1, 1]} : vector<1x128xf32> to vector<1x32xf32>
    %63 = math.tanh %62 : vector<1x32xf32>
    %64 = vector.extract_strided_slice %49 {offsets = [0, 96], sizes = [1, 32], strides = [1, 1]} : vector<1x128xf32> to vector<1x32xf32>
    %65 = arith.negf %64 : vector<1x32xf32>
    %66 = math.exp %65 : vector<1x32xf32>
    %cst_22 = arith.constant 1.000000e+00 : f32
    %67 = vector.broadcast %cst_22 : f32 to vector<1x32xf32>
    %68 = arith.addf %67, %66 : vector<1x32xf32>
    %69 = arith.divf %67, %68 : vector<1x32xf32>
    %70 = arith.mulf %61, %46 : vector<1x32xf32>
    %71 = arith.mulf %55, %63 : vector<1x32xf32>
    %72 = arith.addf %70, %71 : vector<1x32xf32>
    %73 = math.tanh %72 : vector<1x32xf32>
    %74 = arith.mulf %69, %73 : vector<1x32xf32>
    %75 = vector.extract_strided_slice %44 {offsets = [1, 0], sizes = [1, 128], strides = [1, 1]} : vector<8x128xf32> to vector<1x128xf32>
    %cst_23 = arith.constant dense<0.000000e+00> : vector<1x128xf32>
    %76 = tpu.matmul %74, %40, %cst_23 {dimension_numbers = #tpu.dot_dimension_numbers<[1], [0], [0], [1], [0, 0, 1, 1], [], []>} : vector<1x32xf32>, vector<32x128xf32>, vector<1x128xf32> -> vector<1x128xf32>
    %77 = arith.addf %75, %76 : vector<1x128xf32>
    %78 = vector.extract_strided_slice %77 {offsets = [0, 0], sizes = [1, 32], strides = [1, 1]} : vector<1x128xf32> to vector<1x32xf32>
    %79 = arith.negf %78 : vector<1x32xf32>
    %80 = math.exp %79 : vector<1x32xf32>
    %cst_24 = arith.constant 1.000000e+00 : f32
    %81 = vector.broadcast %cst_24 : f32 to vector<1x32xf32>
    %82 = arith.addf %81, %80 : vector<1x32xf32>
    %83 = arith.divf %81, %82 : vector<1x32xf32>
    %84 = vector.extract_strided_slice %77 {offsets = [0, 32], sizes = [1, 32], strides = [1, 1]} : vector<1x128xf32> to vector<1x32xf32>
    %85 = arith.negf %84 : vector<1x32xf32>
    %86 = math.exp %85 : vector<1x32xf32>
    %cst_25 = arith.constant 1.000000e+00 : f32
    %87 = vector.broadcast %cst_25 : f32 to vector<1x32xf32>
    %88 = arith.addf %87, %86 : vector<1x32xf32>
    %89 = arith.divf %87, %88 : vector<1x32xf32>
    %90 = vector.extract_strided_slice %77 {offsets = [0, 64], sizes = [1, 32], strides = [1, 1]} : vector<1x128xf32> to vector<1x32xf32>
    %91 = math.tanh %90 : vector<1x32xf32>
    %92 = vector.extract_strided_slice %77 {offsets = [0, 96], sizes = [1, 32], strides = [1, 1]} : vector<1x128xf32> to vector<1x32xf32>
    %93 = arith.negf %92 : vector<1x32xf32>
    %94 = math.exp %93 : vector<1x32xf32>
    %cst_26 = arith.constant 1.000000e+00 : f32
    %95 = vector.broadcast %cst_26 : f32 to vector<1x32xf32>
    %96 = arith.addf %95, %94 : vector<1x32xf32>
    %97 = arith.divf %95, %96 : vector<1x32xf32>
    %98 = arith.mulf %89, %72 : vector<1x32xf32>
    %99 = arith.mulf %83, %91 : vector<1x32xf32>
    %100 = arith.addf %98, %99 : vector<1x32xf32>
    %101 = math.tanh %100 : vector<1x32xf32>
    %102 = arith.mulf %97, %101 : vector<1x32xf32>
    %103 = vector.extract_strided_slice %44 {offsets = [2, 0], sizes = [1, 128], strides = [1, 1]} : vector<8x128xf32> to vector<1x128xf32>
    %cst_27 = arith.constant dense<0.000000e+00> : vector<1x128xf32>
    %104 = tpu.matmul %102, %40, %cst_27 {dimension_numbers = #tpu.dot_dimension_numbers<[1], [0], [0], [1], [0, 0, 1, 1], [], []>} : vector<1x32xf32>, vector<32x128xf32>, vector<1x128xf32> -> vector<1x128xf32>
    %105 = arith.addf %103, %104 : vector<1x128xf32>
    %106 = vector.extract_strided_slice %105 {offsets = [0, 0], sizes = [1, 32], strides = [1, 1]} : vector<1x128xf32> to vector<1x32xf32>
    %107 = arith.negf %106 : vector<1x32xf32>
    %108 = math.exp %107 : vector<1x32xf32>
    %cst_28 = arith.constant 1.000000e+00 : f32
    %109 = vector.broadcast %cst_28 : f32 to vector<1x32xf32>
    %110 = arith.addf %109, %108 : vector<1x32xf32>
    %111 = arith.divf %109, %110 : vector<1x32xf32>
    %112 = vector.extract_strided_slice %105 {offsets = [0, 32], sizes = [1, 32], strides = [1, 1]} : vector<1x128xf32> to vector<1x32xf32>
    %113 = arith.negf %112 : vector<1x32xf32>
    %114 = math.exp %113 : vector<1x32xf32>
    %cst_29 = arith.constant 1.000000e+00 : f32
    %115 = vector.broadcast %cst_29 : f32 to vector<1x32xf32>
    %116 = arith.addf %115, %114 : vector<1x32xf32>
    %117 = arith.divf %115, %116 : vector<1x32xf32>
    %118 = vector.extract_strided_slice %105 {offsets = [0, 64], sizes = [1, 32], strides = [1, 1]} : vector<1x128xf32> to vector<1x32xf32>
    %119 = math.tanh %118 : vector<1x32xf32>
    %120 = vector.extract_strided_slice %105 {offsets = [0, 96], sizes = [1, 32], strides = [1, 1]} : vector<1x128xf32> to vector<1x32xf32>
    %121 = arith.negf %120 : vector<1x32xf32>
    %122 = math.exp %121 : vector<1x32xf32>
    %cst_30 = arith.constant 1.000000e+00 : f32
    %123 = vector.broadcast %cst_30 : f32 to vector<1x32xf32>
    %124 = arith.addf %123, %122 : vector<1x32xf32>
    %125 = arith.divf %123, %124 : vector<1x32xf32>
    %126 = arith.mulf %117, %100 : vector<1x32xf32>
    %127 = arith.mulf %111, %119 : vector<1x32xf32>
    %128 = arith.addf %126, %127 : vector<1x32xf32>
    %129 = math.tanh %128 : vector<1x32xf32>
    %130 = arith.mulf %125, %129 : vector<1x32xf32>
    %131 = vector.extract_strided_slice %44 {offsets = [3, 0], sizes = [1, 128], strides = [1, 1]} : vector<8x128xf32> to vector<1x128xf32>
    %cst_31 = arith.constant dense<0.000000e+00> : vector<1x128xf32>
    %132 = tpu.matmul %130, %40, %cst_31 {dimension_numbers = #tpu.dot_dimension_numbers<[1], [0], [0], [1], [0, 0, 1, 1], [], []>} : vector<1x32xf32>, vector<32x128xf32>, vector<1x128xf32> -> vector<1x128xf32>
    %133 = arith.addf %131, %132 : vector<1x128xf32>
    %134 = vector.extract_strided_slice %133 {offsets = [0, 0], sizes = [1, 32], strides = [1, 1]} : vector<1x128xf32> to vector<1x32xf32>
    %135 = arith.negf %134 : vector<1x32xf32>
    %136 = math.exp %135 : vector<1x32xf32>
    %cst_32 = arith.constant 1.000000e+00 : f32
    %137 = vector.broadcast %cst_32 : f32 to vector<1x32xf32>
    %138 = arith.addf %137, %136 : vector<1x32xf32>
    %139 = arith.divf %137, %138 : vector<1x32xf32>
    %140 = vector.extract_strided_slice %133 {offsets = [0, 32], sizes = [1, 32], strides = [1, 1]} : vector<1x128xf32> to vector<1x32xf32>
    %141 = arith.negf %140 : vector<1x32xf32>
    %142 = math.exp %141 : vector<1x32xf32>
    %cst_33 = arith.constant 1.000000e+00 : f32
    %143 = vector.broadcast %cst_33 : f32 to vector<1x32xf32>
    %144 = arith.addf %143, %142 : vector<1x32xf32>
    %145 = arith.divf %143, %144 : vector<1x32xf32>
    %146 = vector.extract_strided_slice %133 {offsets = [0, 64], sizes = [1, 32], strides = [1, 1]} : vector<1x128xf32> to vector<1x32xf32>
    %147 = math.tanh %146 : vector<1x32xf32>
    %148 = vector.extract_strided_slice %133 {offsets = [0, 96], sizes = [1, 32], strides = [1, 1]} : vector<1x128xf32> to vector<1x32xf32>
    %149 = arith.negf %148 : vector<1x32xf32>
    %150 = math.exp %149 : vector<1x32xf32>
    %cst_34 = arith.constant 1.000000e+00 : f32
    %151 = vector.broadcast %cst_34 : f32 to vector<1x32xf32>
    %152 = arith.addf %151, %150 : vector<1x32xf32>
    %153 = arith.divf %151, %152 : vector<1x32xf32>
    %154 = arith.mulf %145, %128 : vector<1x32xf32>
    %155 = arith.mulf %139, %147 : vector<1x32xf32>
    %156 = arith.addf %154, %155 : vector<1x32xf32>
    %157 = math.tanh %156 : vector<1x32xf32>
    %158 = arith.mulf %153, %157 : vector<1x32xf32>
    %159 = vector.extract_strided_slice %44 {offsets = [4, 0], sizes = [1, 128], strides = [1, 1]} : vector<8x128xf32> to vector<1x128xf32>
    %cst_35 = arith.constant dense<0.000000e+00> : vector<1x128xf32>
    %160 = tpu.matmul %158, %40, %cst_35 {dimension_numbers = #tpu.dot_dimension_numbers<[1], [0], [0], [1], [0, 0, 1, 1], [], []>} : vector<1x32xf32>, vector<32x128xf32>, vector<1x128xf32> -> vector<1x128xf32>
    %161 = arith.addf %159, %160 : vector<1x128xf32>
    %162 = vector.extract_strided_slice %161 {offsets = [0, 0], sizes = [1, 32], strides = [1, 1]} : vector<1x128xf32> to vector<1x32xf32>
    %163 = arith.negf %162 : vector<1x32xf32>
    %164 = math.exp %163 : vector<1x32xf32>
    %cst_36 = arith.constant 1.000000e+00 : f32
    %165 = vector.broadcast %cst_36 : f32 to vector<1x32xf32>
    %166 = arith.addf %165, %164 : vector<1x32xf32>
    %167 = arith.divf %165, %166 : vector<1x32xf32>
    %168 = vector.extract_strided_slice %161 {offsets = [0, 32], sizes = [1, 32], strides = [1, 1]} : vector<1x128xf32> to vector<1x32xf32>
    %169 = arith.negf %168 : vector<1x32xf32>
    %170 = math.exp %169 : vector<1x32xf32>
    %cst_37 = arith.constant 1.000000e+00 : f32
    %171 = vector.broadcast %cst_37 : f32 to vector<1x32xf32>
    %172 = arith.addf %171, %170 : vector<1x32xf32>
    %173 = arith.divf %171, %172 : vector<1x32xf32>
    %174 = vector.extract_strided_slice %161 {offsets = [0, 64], sizes = [1, 32], strides = [1, 1]} : vector<1x128xf32> to vector<1x32xf32>
    %175 = math.tanh %174 : vector<1x32xf32>
    %176 = vector.extract_strided_slice %161 {offsets = [0, 96], sizes = [1, 32], strides = [1, 1]} : vector<1x128xf32> to vector<1x32xf32>
    %177 = arith.negf %176 : vector<1x32xf32>
    %178 = math.exp %177 : vector<1x32xf32>
    %cst_38 = arith.constant 1.000000e+00 : f32
    %179 = vector.broadcast %cst_38 : f32 to vector<1x32xf32>
    %180 = arith.addf %179, %178 : vector<1x32xf32>
    %181 = arith.divf %179, %180 : vector<1x32xf32>
    %182 = arith.mulf %173, %156 : vector<1x32xf32>
    %183 = arith.mulf %167, %175 : vector<1x32xf32>
    %184 = arith.addf %182, %183 : vector<1x32xf32>
    %185 = math.tanh %184 : vector<1x32xf32>
    %186 = arith.mulf %181, %185 : vector<1x32xf32>
    %187 = vector.extract_strided_slice %44 {offsets = [5, 0], sizes = [1, 128], strides = [1, 1]} : vector<8x128xf32> to vector<1x128xf32>
    %cst_39 = arith.constant dense<0.000000e+00> : vector<1x128xf32>
    %188 = tpu.matmul %186, %40, %cst_39 {dimension_numbers = #tpu.dot_dimension_numbers<[1], [0], [0], [1], [0, 0, 1, 1], [], []>} : vector<1x32xf32>, vector<32x128xf32>, vector<1x128xf32> -> vector<1x128xf32>
    %189 = arith.addf %187, %188 : vector<1x128xf32>
    %190 = vector.extract_strided_slice %189 {offsets = [0, 0], sizes = [1, 32], strides = [1, 1]} : vector<1x128xf32> to vector<1x32xf32>
    %191 = arith.negf %190 : vector<1x32xf32>
    %192 = math.exp %191 : vector<1x32xf32>
    %cst_40 = arith.constant 1.000000e+00 : f32
    %193 = vector.broadcast %cst_40 : f32 to vector<1x32xf32>
    %194 = arith.addf %193, %192 : vector<1x32xf32>
    %195 = arith.divf %193, %194 : vector<1x32xf32>
    %196 = vector.extract_strided_slice %189 {offsets = [0, 32], sizes = [1, 32], strides = [1, 1]} : vector<1x128xf32> to vector<1x32xf32>
    %197 = arith.negf %196 : vector<1x32xf32>
    %198 = math.exp %197 : vector<1x32xf32>
    %cst_41 = arith.constant 1.000000e+00 : f32
    %199 = vector.broadcast %cst_41 : f32 to vector<1x32xf32>
    %200 = arith.addf %199, %198 : vector<1x32xf32>
    %201 = arith.divf %199, %200 : vector<1x32xf32>
    %202 = vector.extract_strided_slice %189 {offsets = [0, 64], sizes = [1, 32], strides = [1, 1]} : vector<1x128xf32> to vector<1x32xf32>
    %203 = math.tanh %202 : vector<1x32xf32>
    %204 = vector.extract_strided_slice %189 {offsets = [0, 96], sizes = [1, 32], strides = [1, 1]} : vector<1x128xf32> to vector<1x32xf32>
    %205 = arith.negf %204 : vector<1x32xf32>
    %206 = math.exp %205 : vector<1x32xf32>
    %cst_42 = arith.constant 1.000000e+00 : f32
    %207 = vector.broadcast %cst_42 : f32 to vector<1x32xf32>
    %208 = arith.addf %207, %206 : vector<1x32xf32>
    %209 = arith.divf %207, %208 : vector<1x32xf32>
    %210 = arith.mulf %201, %184 : vector<1x32xf32>
    %211 = arith.mulf %195, %203 : vector<1x32xf32>
    %212 = arith.addf %210, %211 : vector<1x32xf32>
    %213 = math.tanh %212 : vector<1x32xf32>
    %214 = arith.mulf %209, %213 : vector<1x32xf32>
    %215 = vector.extract_strided_slice %44 {offsets = [6, 0], sizes = [1, 128], strides = [1, 1]} : vector<8x128xf32> to vector<1x128xf32>
    %cst_43 = arith.constant dense<0.000000e+00> : vector<1x128xf32>
    %216 = tpu.matmul %214, %40, %cst_43 {dimension_numbers = #tpu.dot_dimension_numbers<[1], [0], [0], [1], [0, 0, 1, 1], [], []>} : vector<1x32xf32>, vector<32x128xf32>, vector<1x128xf32> -> vector<1x128xf32>
    %217 = arith.addf %215, %216 : vector<1x128xf32>
    %218 = vector.extract_strided_slice %217 {offsets = [0, 0], sizes = [1, 32], strides = [1, 1]} : vector<1x128xf32> to vector<1x32xf32>
    %219 = arith.negf %218 : vector<1x32xf32>
    %220 = math.exp %219 : vector<1x32xf32>
    %cst_44 = arith.constant 1.000000e+00 : f32
    %221 = vector.broadcast %cst_44 : f32 to vector<1x32xf32>
    %222 = arith.addf %221, %220 : vector<1x32xf32>
    %223 = arith.divf %221, %222 : vector<1x32xf32>
    %224 = vector.extract_strided_slice %217 {offsets = [0, 32], sizes = [1, 32], strides = [1, 1]} : vector<1x128xf32> to vector<1x32xf32>
    %225 = arith.negf %224 : vector<1x32xf32>
    %226 = math.exp %225 : vector<1x32xf32>
    %cst_45 = arith.constant 1.000000e+00 : f32
    %227 = vector.broadcast %cst_45 : f32 to vector<1x32xf32>
    %228 = arith.addf %227, %226 : vector<1x32xf32>
    %229 = arith.divf %227, %228 : vector<1x32xf32>
    %230 = vector.extract_strided_slice %217 {offsets = [0, 64], sizes = [1, 32], strides = [1, 1]} : vector<1x128xf32> to vector<1x32xf32>
    %231 = math.tanh %230 : vector<1x32xf32>
    %232 = vector.extract_strided_slice %217 {offsets = [0, 96], sizes = [1, 32], strides = [1, 1]} : vector<1x128xf32> to vector<1x32xf32>
    %233 = arith.negf %232 : vector<1x32xf32>
    %234 = math.exp %233 : vector<1x32xf32>
    %cst_46 = arith.constant 1.000000e+00 : f32
    %235 = vector.broadcast %cst_46 : f32 to vector<1x32xf32>
    %236 = arith.addf %235, %234 : vector<1x32xf32>
    %237 = arith.divf %235, %236 : vector<1x32xf32>
    %238 = arith.mulf %229, %212 : vector<1x32xf32>
    %239 = arith.mulf %223, %231 : vector<1x32xf32>
    %240 = arith.addf %238, %239 : vector<1x32xf32>
    %241 = math.tanh %240 : vector<1x32xf32>
    %242 = arith.mulf %237, %241 : vector<1x32xf32>
    %243 = vector.extract_strided_slice %44 {offsets = [7, 0], sizes = [1, 128], strides = [1, 1]} : vector<8x128xf32> to vector<1x128xf32>
    %cst_47 = arith.constant dense<0.000000e+00> : vector<1x128xf32>
    %244 = tpu.matmul %242, %40, %cst_47 {dimension_numbers = #tpu.dot_dimension_numbers<[1], [0], [0], [1], [0, 0, 1, 1], [], []>} : vector<1x32xf32>, vector<32x128xf32>, vector<1x128xf32> -> vector<1x128xf32>
    %245 = arith.addf %243, %244 : vector<1x128xf32>
    %246 = vector.extract_strided_slice %245 {offsets = [0, 0], sizes = [1, 32], strides = [1, 1]} : vector<1x128xf32> to vector<1x32xf32>
    %247 = arith.negf %246 : vector<1x32xf32>
    %248 = math.exp %247 : vector<1x32xf32>
    %cst_48 = arith.constant 1.000000e+00 : f32
    %249 = vector.broadcast %cst_48 : f32 to vector<1x32xf32>
    %250 = arith.addf %249, %248 : vector<1x32xf32>
    %251 = arith.divf %249, %250 : vector<1x32xf32>
    %252 = vector.extract_strided_slice %245 {offsets = [0, 32], sizes = [1, 32], strides = [1, 1]} : vector<1x128xf32> to vector<1x32xf32>
    %253 = arith.negf %252 : vector<1x32xf32>
    %254 = math.exp %253 : vector<1x32xf32>
    %cst_49 = arith.constant 1.000000e+00 : f32
    %255 = vector.broadcast %cst_49 : f32 to vector<1x32xf32>
    %256 = arith.addf %255, %254 : vector<1x32xf32>
    %257 = arith.divf %255, %256 : vector<1x32xf32>
    %258 = vector.extract_strided_slice %245 {offsets = [0, 64], sizes = [1, 32], strides = [1, 1]} : vector<1x128xf32> to vector<1x32xf32>
    %259 = math.tanh %258 : vector<1x32xf32>
    %260 = vector.extract_strided_slice %245 {offsets = [0, 96], sizes = [1, 32], strides = [1, 1]} : vector<1x128xf32> to vector<1x32xf32>
    %261 = arith.negf %260 : vector<1x32xf32>
    %262 = math.exp %261 : vector<1x32xf32>
    %cst_50 = arith.constant 1.000000e+00 : f32
    %263 = vector.broadcast %cst_50 : f32 to vector<1x32xf32>
    %264 = arith.addf %263, %262 : vector<1x32xf32>
    %265 = arith.divf %263, %264 : vector<1x32xf32>
    %266 = arith.mulf %257, %240 : vector<1x32xf32>
    %267 = arith.mulf %251, %259 : vector<1x32xf32>
    %268 = arith.addf %266, %267 : vector<1x32xf32>
    %269 = math.tanh %268 : vector<1x32xf32>
    %270 = arith.mulf %265, %269 : vector<1x32xf32>
    %271 = tpu.concatenate %74, %102, %130, %158, %186, %214, %242, %270 in 0 : vector<1x32xf32>, vector<1x32xf32>, vector<1x32xf32>, vector<1x32xf32>, vector<1x32xf32>, vector<1x32xf32>, vector<1x32xf32>, vector<1x32xf32> -> vector<8x32xf32>
    %272 = tpu.iota {dimensions = array<i32: 0>} : vector<8x1xi32>
    %273 = vector.broadcast %0 : i32 to vector<8x1xi32>
    %274 = arith.cmpi sge, %272, %273 : vector<8x1xi32>
    %275 = vector.broadcast %1 : i32 to vector<8x1xi32>
    %276 = arith.cmpi sle, %272, %275 : vector<8x1xi32>
    %277 = arith.andi %274, %276 : vector<8x1xi1>
    %278 = arith.subi %1, %0 : i32
    %c1_i32 = arith.constant 1 : i32
    %279 = arith.addi %278, %c1_i32 : i32
    %280 = arith.sitofp %279 : i32 to f32
    %cst_51 = arith.constant 0.000000e+00 : f32
    %281 = vector.shape_cast %277 : vector<8x1xi1> to vector<8x1xi1>
    %282 = vector.broadcast %281 : vector<8x1xi1> to vector<8x32xi1>
    %283 = vector.broadcast %cst_51 : f32 to vector<8x32xf32>
    %284 = arith.select %282, %271, %283 : vector<8x32xi1>, vector<8x32xf32>
    %cst_52 = arith.constant dense<0.000000e+00> : vector<32xf32>
    %285 = vector.multi_reduction <add>, %284, %cst_52 [0] : vector<8x32xf32> to vector<32xf32>
    %286 = vector.shape_cast %285 : vector<32xf32> to vector<1x32xf32>
    %287 = vector.broadcast %280 : f32 to vector<1x32xf32>
    %288 = arith.divf %286, %287 : vector<1x32xf32>
    %c64 = arith.constant 64 : index
    %c0_53 = arith.constant 0 : index
    %289 = vector.load %arg3[%c64, %c0_53] : memref<384x128xf32, #tpu.memory_space<vmem>>, vector<32x128xf32>
    %cst_54 = arith.constant dense<0.000000e+00> : vector<8x128xf32>
    %290 = tpu.matmul %271, %289, %cst_54 {dimension_numbers = #tpu.dot_dimension_numbers<[1], [0], [0], [1], [0, 0, 1, 1], [], []>} : vector<8x32xf32>, vector<32x128xf32>, vector<8x128xf32> -> vector<8x128xf32>
    %c96 = arith.constant 96 : index
    %c0_55 = arith.constant 0 : index
    %291 = vector.load %arg3[%c96, %c0_55] : memref<384x128xf32, #tpu.memory_space<vmem>>, vector<32x128xf32>
    %cst_56 = arith.constant dense<0.000000e+00> : vector<1x128xf32>
    %292 = tpu.matmul %288, %291, %cst_56 {dimension_numbers = #tpu.dot_dimension_numbers<[1], [0], [0], [1], [0, 0, 1, 1], [], []>} : vector<1x32xf32>, vector<32x128xf32>, vector<1x128xf32> -> vector<1x128xf32>
    %293 = vector.broadcast %292 : vector<1x128xf32> to vector<8x128xf32>
    %294 = arith.addf %290, %293 : vector<8x128xf32>
    %295 = math.tanh %294 : vector<8x128xf32>
    %c128 = arith.constant 128 : index
    %c0_57 = arith.constant 0 : index
    %296 = vector.load %arg3[%c128, %c0_57] : memref<384x128xf32, #tpu.memory_space<vmem>>, vector<128x128xf32>
    %cst_58 = arith.constant dense<0.000000e+00> : vector<8x128xf32>
    %297 = tpu.matmul %295, %296, %cst_58 {dimension_numbers = #tpu.dot_dimension_numbers<[1], [0], [0], [1], [0, 0, 1, 1], [], []>} : vector<8x128xf32>, vector<128x128xf32>, vector<8x128xf32> -> vector<8x128xf32>
    %298 = vector.extract_strided_slice %297 {offsets = [0, 0], sizes = [8, 3], strides = [1, 1]} : vector<8x128xf32> to vector<8x3xf32>
    %299 = tpu.iota {dimensions = array<i32: 0>} : vector<8x3xi32>
    %300 = tpu.iota {dimensions = array<i32: 1>} : vector<8x3xi32>
    %c0_i32 = arith.constant 0 : i32
    %301 = vector.broadcast %c0_i32 : i32 to vector<8x3xi32>
    %302 = arith.cmpi eq, %300, %301 : vector<8x3xi32>
    %c1_i32_59 = arith.constant 1 : i32
    %303 = vector.broadcast %c1_i32_59 : i32 to vector<8x3xi32>
    %304 = arith.cmpi eq, %300, %303 : vector<8x3xi32>
    %305 = vector.broadcast %0 : i32 to vector<8x3xi32>
    %306 = arith.cmpi slt, %299, %305 : vector<8x3xi32>
    %307 = arith.andi %304, %306 : vector<8x3xi1>
    %308 = arith.ori %302, %307 : vector<8x3xi1>
    %c2_i32 = arith.constant 2 : i32
    %309 = vector.broadcast %c2_i32 : i32 to vector<8x3xi32>
    %310 = arith.cmpi eq, %300, %309 : vector<8x3xi32>
    %311 = vector.broadcast %1 : i32 to vector<8x3xi32>
    %312 = arith.cmpi sgt, %299, %311 : vector<8x3xi32>
    %313 = arith.andi %310, %312 : vector<8x3xi1>
    %314 = arith.ori %308, %313 : vector<8x3xi1>
    %cst_60 = arith.constant -1.000000e+30 : f32
    %315 = vector.broadcast %cst_60 : f32 to vector<8x3xf32>
    %316 = arith.select %314, %298, %315 : vector<8x3xi1>, vector<8x3xf32>
    %cst_61 = arith.constant dense<0xFF800000> : vector<3xf32>
    %317 = vector.multi_reduction <maximumf>, %316, %cst_61 [0] : vector<8x3xf32> to vector<3xf32>
    %318 = vector.shape_cast %317 : vector<3xf32> to vector<1x3xf32>
    %319 = vector.broadcast %318 : vector<1x3xf32> to vector<8x3xf32>
    %320 = arith.subf %316, %319 : vector<8x3xf32>
    %321 = math.exp %320 : vector<8x3xf32>
    %cst_62 = arith.constant 0.000000e+00 : f32
    %322 = vector.broadcast %cst_62 : f32 to vector<8x3xf32>
    %323 = arith.select %314, %321, %322 : vector<8x3xi1>, vector<8x3xf32>
    %cst_63 = arith.constant dense<0.000000e+00> : vector<3xf32>
    %324 = vector.multi_reduction <add>, %323, %cst_63 [0] : vector<8x3xf32> to vector<3xf32>
    %325 = vector.shape_cast %324 : vector<3xf32> to vector<1x3xf32>
    %cst_64 = arith.constant 1.000000e-30 : f32
    %326 = vector.broadcast %cst_64 : f32 to vector<1x3xf32>
    %327 = arith.maximumf %325, %326 : vector<1x3xf32>
    %328 = tpu.reciprocal %327 {approx = true} : vector<1x3xf32> -> vector<1x3xf32>
    %329 = vector.broadcast %328 : vector<1x3xf32> to vector<8x3xf32>
    %330 = arith.mulf %323, %329 : vector<8x3xf32>
    %331 = vector.extract_strided_slice %330 {offsets = [0, 0], sizes = [8, 1], strides = [1, 1]} : vector<8x3xf32> to vector<8x1xf32>
    %332 = vector.broadcast %331 : vector<8x1xf32> to vector<8x32xf32>
    %333 = arith.mulf %332, %271 : vector<8x32xf32>
    %cst_65 = arith.constant dense<0.000000e+00> : vector<32xf32>
    %334 = vector.multi_reduction <add>, %333, %cst_65 [0] : vector<8x32xf32> to vector<32xf32>
    %335 = vector.shape_cast %334 : vector<32xf32> to vector<1x32xf32>
    %c256 = arith.constant 256 : index
    %c0_66 = arith.constant 0 : index
    %336 = vector.load %arg3[%c256, %c0_66] : memref<384x128xf32, #tpu.memory_space<vmem>>, vector<32x128xf32>
    %cst_67 = arith.constant dense<0.000000e+00> : vector<1x128xf32>
    %337 = tpu.matmul %335, %336, %cst_67 {dimension_numbers = #tpu.dot_dimension_numbers<[1], [0], [0], [1], [0, 0, 1, 1], [], []>} : vector<1x32xf32>, vector<32x128xf32>, vector<1x128xf32> -> vector<1x128xf32>
    %338 = vector.extract_strided_slice %330 {offsets = [0, 1], sizes = [8, 1], strides = [1, 1]} : vector<8x3xf32> to vector<8x1xf32>
    %339 = vector.broadcast %338 : vector<8x1xf32> to vector<8x32xf32>
    %340 = arith.mulf %339, %271 : vector<8x32xf32>
    %cst_68 = arith.constant dense<0.000000e+00> : vector<32xf32>
    %341 = vector.multi_reduction <add>, %340, %cst_68 [0] : vector<8x32xf32> to vector<32xf32>
    %342 = vector.shape_cast %341 : vector<32xf32> to vector<1x32xf32>
    %c288 = arith.constant 288 : index
    %c0_69 = arith.constant 0 : index
    %343 = vector.load %arg3[%c288, %c0_69] : memref<384x128xf32, #tpu.memory_space<vmem>>, vector<32x128xf32>
    %cst_70 = arith.constant dense<0.000000e+00> : vector<1x128xf32>
    %344 = tpu.matmul %342, %343, %cst_70 {dimension_numbers = #tpu.dot_dimension_numbers<[1], [0], [0], [1], [0, 0, 1, 1], [], []>} : vector<1x32xf32>, vector<32x128xf32>, vector<1x128xf32> -> vector<1x128xf32>
    %345 = arith.addf %337, %344 : vector<1x128xf32>
    %346 = vector.extract_strided_slice %330 {offsets = [0, 2], sizes = [8, 1], strides = [1, 1]} : vector<8x3xf32> to vector<8x1xf32>
    %347 = vector.broadcast %346 : vector<8x1xf32> to vector<8x32xf32>
    %348 = arith.mulf %347, %271 : vector<8x32xf32>
    %cst_71 = arith.constant dense<0.000000e+00> : vector<32xf32>
    %349 = vector.multi_reduction <add>, %348, %cst_71 [0] : vector<8x32xf32> to vector<32xf32>
    %350 = vector.shape_cast %349 : vector<32xf32> to vector<1x32xf32>
    %c320 = arith.constant 320 : index
    %c0_72 = arith.constant 0 : index
    %351 = vector.load %arg3[%c320, %c0_72] : memref<384x128xf32, #tpu.memory_space<vmem>>, vector<32x128xf32>
    %cst_73 = arith.constant dense<0.000000e+00> : vector<1x128xf32>
    %352 = tpu.matmul %350, %351, %cst_73 {dimension_numbers = #tpu.dot_dimension_numbers<[1], [0], [0], [1], [0, 0, 1, 1], [], []>} : vector<1x32xf32>, vector<32x128xf32>, vector<1x128xf32> -> vector<1x128xf32>
    %353 = arith.addf %345, %352 : vector<1x128xf32>
    %c1_74 = arith.constant 1 : index
    %c0_75 = arith.constant 0 : index
    %354 = vector.load %arg4[%c1_74, %c0_75] : memref<8x128xf32, #tpu.memory_space<vmem>>, vector<1x128xf32>
    %355 = arith.addf %353, %354 : vector<1x128xf32>
    %356 = vector.extract_strided_slice %355 {offsets = [0, 0], sizes = [1, 32], strides = [1, 1]} : vector<1x128xf32> to vector<1x32xf32>
    %c352 = arith.constant 352 : index
    %c0_76 = arith.constant 0 : index
    %357 = vector.load %arg3[%c352, %c0_76] : memref<384x128xf32, #tpu.memory_space<vmem>>, vector<32x128xf32>
    %cst_77 = arith.constant dense<0.000000e+00> : vector<1x128xf32>
    %358 = tpu.matmul %356, %357, %cst_77 {dimension_numbers = #tpu.dot_dimension_numbers<[1], [0], [0], [1], [0, 0, 1, 1], [], []>} : vector<1x32xf32>, vector<32x128xf32>, vector<1x128xf32> -> vector<1x128xf32>
    %c2_78 = arith.constant 2 : index
    %c0_79 = arith.constant 0 : index
    %359 = vector.load %arg4[%c2_78, %c0_79] : memref<8x128xf32, #tpu.memory_space<vmem>>, vector<1x128xf32>
    %360 = arith.addf %358, %359 : vector<1x128xf32>
    %361 = vector.extract_strided_slice %360 {offsets = [0, 0], sizes = [1, 3], strides = [1, 1]} : vector<1x128xf32> to vector<1x3xf32>
    %c0_80 = arith.constant 0 : index
    %c0_81 = arith.constant 0 : index
    %362 = vector.load %arg5[%c0_80, %c0_81] : memref<1x3xf32, #tpu.memory_space<vmem>>, vector<1x3xf32>
    tpu.vector_store %arg5[%c0_80, %c0_81], %361 {strides = array<i32>} : memref<1x3xf32, #tpu.memory_space<vmem>>, vector<1x3xf32>,
    return
  }
  func.func @transform_0(%arg0: i32, %arg1: memref<10xi32, #tpu.memory_space<smem>>) -> (i32, i32) {
    %c0_i32 = arith.constant 0 : i32
    %c0_i32_0 = arith.constant 0 : i32
    %c0_i32_1 = arith.constant 0 : i32
    return %c0_i32, %c0_i32_0 : i32, i32
  }
  func.func @transform_1(%arg0: i32, %arg1: memref<10xi32, #tpu.memory_space<smem>>) -> (i32, i32) {
    %c0_i32 = arith.constant 0 : i32
    %c0_i32_0 = arith.constant 0 : i32
    %c0_i32_1 = arith.constant 0 : i32
    return %c0_i32, %c0_i32_0 : i32, i32
  }
  func.func @transform_2(%arg0: i32, %arg1: memref<10xi32, #tpu.memory_space<smem>>) -> (i32, i32) {
    %c0_i32 = arith.constant 0 : i32
    %c0_i32_0 = arith.constant 0 : i32
    %c0_i32_1 = arith.constant 0 : i32
    return %c0_i32, %c0_i32_0 : i32, i32
  }
  func.func @transform_3(%arg0: i32, %arg1: memref<10xi32, #tpu.memory_space<smem>>) -> (i32, i32) {
    %c0_i32 = arith.constant 0 : i32
    %c0_i32_0 = arith.constant 0 : i32
    %c0_i32_1 = arith.constant 0 : i32
    return %c0_i32, %c0_i32_0 : i32, i32
  }
}

</mosaic_0001>

<bundles_post_ra>
// kernel: attention_context_forward.1
= control target key start
LH: loop header
LB: loop body
LE: loop exit
PB: predicated region body
PF: predicated region fallthrough
CT: control target
= control target key end

     0   :  { %s2664_s0 = inlined_call_operand.vmem [shape: s32[10], index: 0, kind: input, shape index: {}]   ;;  %s2665_s1 = inlined_call_operand.vmem [shape: f32[50,32], index: 1, kind: input, shape index: {}]   ;;  %s2666_s2 = inlined_call_operand.hbm [shape: f32[384,128], index: 2, kind: input, shape index: {}]   ;;  %s2667_s3 = inlined_call_operand.vmem [shape: f32[8,128], index: 3, kind: input, shape index: {}]   ;;  %s2668_s4 = inlined_call_operand.hbm [shape: f32[1,3], index: 4, kind: output, shape index: {}]  }
   0x1   :  { %s9_s17 = sshll.u32 %s2664_s0, 4  ;;  %s10_s17 = int_to_ptr.vmem [resolvable:$true] %s9_s17 }
   0x2   :  { %s2271_s18 = scalar_lea.vmem %s10_s17, 16  ;;  %p2276_p1 = scmp.lt.s32.totalorder %s10_s17, %s10_s17 }
   0x3   :  { %p2272_p0 = scmp.ne.s32.totalorder %s10_s17, %s2271_s18  ;;  %p2277_p2 = scmp.lt.s32.totalorder %s2271_s18, %s2271_s18 }
   0x5   :  { %p2278_p3 = por %p2277_p2, %p2276_p1 }
   0x7   :  { %p2279_p4 = pnand %p2278_p3, %p2272_p0 }
   0x9   :  { %2282 = shalt.err (!%p2279_p4)  }
   0xa   :  { %s2333_s19 = smov [#allocation3]  }
   0xb   :  { %12 = dma.vmem_to_smem %s10_s17, 16, %s2333_s19, [#allocation2] }
   0xc   :  { %2327 = dma.done.wait [#allocation2], 16 }
   0xd   :  { %2328 = vsyncadd [#allocation2], 4294967280 }
   0xe   :  { %14 = sfence }
   0xf   :  { %15 = vsyncpa [#allocation5], 0 }
  0x10   :  { %16 = vsyncpa [#allocation6], 0  ;;  %s2334_s20 = smov [#allocation4]   ;;  %s2283_s23 = scalar_lea.hbm %s2666_s2, 6144 }
  0x11   :  { %s24_s21 = sshll.u32 %s2334_s20, 4  ;;  %p2284_p5 = scmp.ne.s32.totalorder %s2666_s2, %s2283_s23  ;;  %s25_s21 = int_to_ptr.vmem [resolvable:$true] %s24_s21 }
  0x12   :  { %p2287_p6 = scmp.lt.u32.totalorder %s2283_s23, %s2666_s2 }
  0x14   :  { %p2289_p7 = pnand %p2287_p6, %p2284_p5 }
  0x16   :  { %2292 = shalt.err (!%p2289_p7)
}
  0x17   :  { %s2293_s28 = scalar_lea.vmem %s25_s21, 6144  ;;  %p2298_p9 = scmp.lt.s32.totalorder %s25_s21, %s25_s21 }
  0x18   :  { %p2294_p8 = scmp.ne.s32.totalorder %s25_s21, %s2293_s28  ;;  %p2299_p10 = scmp.lt.s32.totalorder %s2293_s28, %s2293_s28 }
  0x1a   :  { %p2300_p11 = por %p2299_p10, %p2298_p9 }
  0x1c   :  { %p2301_p12 = pnand %p2300_p11, %p2294_p8 }
  0x1e   :  { %2304 = shalt.err (!%p2301_p12)
}
  0x1f   :  { %s2335_s29 = smov 128   ;;  %s2336_s30 = smov 8  }
  0x20   :  { %30 = dma.hbm_to_vmem [thread:$0]  %s2666_s2, 6144, %s25_s21, [#allocation5], %s2335_s29, %s2335_s29, %s2336_s30  }
  0x21   :  { %2329 = dma.done.wait [#allocation5], 6144  }
  0x22   :  { %2330 = vsyncadd [#allocation5], 4294961152  ;;  %s1741_s7 = sld [smem:[#allocation3 + $0x2]]  ;;  %s1742_s8 = sld [smem:[#allocation3 + $0x3]]  ;;  %vm83_vm0 = vcmask 1040384   ;;  %vm85_vm1 = vcmask 1041408  }
  0x23   :  { %s1743_s9 = sld [smem:[#allocation3 + $0x4]]  ;;  %s1744_s10 = sld [smem:[#allocation3 + $0x5]]  ;;  %vm87_vm2 = vcmask 1042432   ;;  %vm89_vm3 = vcmask 1043456   ;;  %vm91_vm4 = vcmask 1044480   ;;  %vm93_vm5 = vcmask 1045504  }
  0x24   :  { %s1745_s11 = sld [smem:[#allocation3 + $0x6]]  ;;  %s1746_s12 = sld [smem:[#allocation3 + $0x7]]  ;;  %vm95_vm6 = vcmask 1046528   ;;  %vm98_vm7 = vcmask 261120   ;;  %v114_v24 = vld [vmem:[#allocation4] sm:$0xff]  ;;  %v115_v25 = vld [vmem:[#allocation4 + $0x8] sm:$0xff] }
  0x25   :  { %s1747_s13 = sld [smem:[#allocation3 + $0x8]]  ;;  %s1748_s14 = sld [smem:[#allocation3 + $0x9]]  ;;  %v118_v26 = vld [vmem:[#allocation4 + $0x20] sm:$0xff]  ;;  %v2337_v27 = vmov 0.0|0.0   ;;  %v2065_v28 = vpack.c.bf16 %v115_v25, %v114_v24  ;;  %v119_v29 = vld [vmem:[#allocation4 + $0x28] sm:$0xff]  ;;  %v116_v30 = vld [vmem:[#allocation4 + $0x10] sm:$0xff] }
  0x26   :  { %2064 = vmatprep.subr.bf16.mxu0 %v2337_v27  ;;  %2070 = vmatprep.subr.bf16.mxu1 %v2337_v27  ;;  %v117_v31 = vld [vmem:[#allocation4 + $0x18] sm:$0xff]  ;;  %v2420_v32 = vpack.c.bf16 %v119_v29, %v118_v26  ;;  %v120_v33 = vld [vmem:[#allocation4 + $0x30] sm:$0xff]  ;;  %vm2338_vm8 = vmmov 0   ;;  %v2339_v35 = vmov 0.0   ;;  %v1749_v51 = vld [vmem:[%s2667_s3] ss:$0 sm:$0xff] }
  0x27   :  { %v121_v34 = vld [vmem:[#allocation4 + $0x38] sm:$0xff]  ;;  %1872 = vmatprep.mubr.msk.f32.mxu0 %vm2338_vm8, %v2339_v35  ;;  %1883 = vmatprep.mubr.msk.f32.mxu1 %vm2338_vm8, %v2339_v35  ;;  %v2068_v36 = vpack.c.bf16 %v117_v31, %v116_v30  ;;  %s2549_s15 = sld [smem:[#allocation3 + $0x1]]  ;;  %vm1066_vm14 = vcmask 1048320  }
  0x28   :  { %s39_s17 = scalar_lea.vmem %s2665_s1, %s1741_s7  ;;  %s42_s20 = scalar_lea.vmem %s2665_s1, %s1742_s8  ;;  %2066 = vmatpush3.bf16.msra.mxu0 %v2065_v28  ;;  %2072 = vmatpush3.bf16.msra.mxu1 %v2420_v32  ;;  %v2428_v37 = vpack.c.bf16 %v121_v34, %v120_v33 }
  0x29   :  { %v40_v0 = vld [vmem:[%s39_s17] sm:$0x1]  ;;  %s45_s22 = scalar_lea.vmem %s2665_s1, %s1743_s9  ;;  %s48_s24 = scalar_lea.vmem %s2665_s1, %s1744_s10  ;;  %2067 = vmatprep.subr.bf16.mxu0 %v2337_v27  ;;  %2073 = vmatprep.subr.bf16.mxu1 %v2337_v27 }
  0x2a   :  { %v43_v1 = vld [vmem:[%s42_s20] sm:$0x1]  ;;  %s51_s27 = scalar_lea.vmem %s2665_s1, %s1745_s11  ;;  %s54_s30 = scalar_lea.vmem %s2665_s1, %s1746_s12 }
  0x2b   :  { %v46_v2 = vld [vmem:[%s45_s22] sm:$0x1]  ;;  %v63_v4 = vrot.slane %v43_v1, 7  ;;  %s57_s7 = scalar_lea.vmem %s2665_s1, %s1747_s13  ;;  %s60_s10 = scalar_lea.vmem %s2665_s1, %s1748_s14 }
  0x2c   :  { %v49_v3 = vld [vmem:[%s48_s24] sm:$0x1]  ;;  %v66_v7 = vrot.slane %v46_v2, 6  ;;  %2069 = vmatpush3.bf16.msra.mxu0 %v2068_v36  ;;  %2075 = vmatpush3.bf16.msra.mxu1 %v2428_v37  ;;  %s2340_s12 = smov 64   ;;  %s2341_s13 = smov 32  }
  0x2d   :  { %v52_v5 = vld [vmem:[%s51_s27] sm:$0x1]  ;;  %v69_v8 = vrot.slane %v49_v3, 5  ;;  %v84_v13 = vsel %vm83_vm0, %v40_v0, %v63_v4  ;;  %2076 = vmatprep.subr.bf16.mxu0 %v2337_v27  ;;  %2082 = vmatprep.subr.bf16.mxu1 %v2337_v27  ;;  %s2547_s14 = sld [smem:[#allocation3]]  ;;  %s2345_s22 = smov [#allocation7]  }
  0x2e   :  { %v55_v6 = vld [vmem:[%s54_s30] sm:$0x1]  ;;  %v72_v11 = vrot.slane %v52_v5, 4  ;;  %v86_v15 = vsel %vm85_vm1, %v84_v13, %v66_v7  ;;  %s1723_s0 = sshll.u32 %s2345_s22, 4  ;;  %s1724_s0 = int_to_ptr.vmem [resolvable:$true] %s1723_s0 }
  0x2f   :  { %v58_v9 = vld [vmem:[%s57_s7] sm:$0x1]  ;;  %v75_v12 = vrot.slane %v55_v6, 3  ;;  %v88_v17 = vsel %vm87_vm2, %v86_v15, %v69_v8  ;;  %1884 = vmatmul.mubr.f32.vlgmr.msra.gmra.mrb[0].mxu1 %v2339_v35  ;;  %s2305_s23 = scalar_lea.vmem %s1724_s0, 16  ;;  %s2309_s24 = scalar_lea.vmem %s1724_s0, 32 }
  0x30   :  { %v61_v10 = vld [vmem:[%s60_s10] sm:$0x1]  ;;  %v78_v14 = vrot.slane %v58_v9, 2  ;;  %v90_v18 = vsel %vm89_vm3, %v88_v17, %v72_v11  ;;  %2084 = vmatpush3.bf16.msra.mxu1 %v2420_v32  ;;  %1905 = vmatprep.mubr.msk.f32.mxu1 %vm2338_vm8, %v2339_v35  ;;  %p2306_p13 = scmp.ne.s32.totalorder %s1724_s0, %s2305_s23  ;;  %p2310_p0 = scmp.lt.s32.totalorder %s1724_s0, %s1724_s0 }
  0x31   :  { %v81_v16 = vrot.slane %v61_v10, 1  ;;  %v92_v19 = vsel %vm91_vm4, %v90_v18, %v75_v12  ;;  %2085 = vmatprep.subr.bf16.mxu1 %v2337_v27  ;;  %p2311_p1 = scmp.lt.s32.totalorder %s2309_s24, %s2305_s23 }
  0x32   :  { %v94_v20 = vsel %vm93_vm5, %v92_v19, %v78_v14 }
  0x33   :  { %v96_v21 = vsel %vm95_vm6, %v94_v20, %v81_v16  ;;  %s1060_s16 = ssub.s32 %s2549_s15, %s2547_s14  ;;  %p2312_p2 = por %p2311_p1, %p2310_p0 }
  0x34   :  { %v97_v22 = vmul.f32 %v96_v21, %v96_v21  ;;  %2087 = vmatpush3.bf16.msra.mxu1 %v2428_v37  ;;  %s1061_s17 = sadd.s32 1, %s1060_s16 }
  0x35   :  { %2094 = vmatprep.subr.bf16.mxu1 %v2337_v27  ;;  %s1062_s18 = scvt.s32.f32 %s1061_s17  ;;  %p2313_p3 = pnand %p2312_p2, %p2306_p13 }
  0x36   :  { %v99_v23 = vsel %vm98_vm7, %v97_v22, 0.0 }
  0x37   :  { %100 = vadd.xlane.f32.xlu0 %v99_v23 }
  0xc4   :  { %v101_v38 = vpop.xlane.xlu0 %100 }
  0xc5   :  { %2195 = vrsqrt.f32 %v101_v38  ;;  %vm104_vm9 = vcmp.eq.f32.partialorder %v101_v38, inf  ;;  %v107_v41 = vand.u32 2147483648, %v101_v38  ;;  %vm106_vm10 = vcmp.eq.f32.partialorder %v101_v38, 0.0 }
  0xcf   :  { %v2196_v39 = vpop.eup %2195 }
  0xd0   :  { %v103_v40 = vmul.f32 %v2196_v39, %v101_v38 }
  0xd2   :  { %v105_v42 = vsel %vm104_vm9, %v101_v38, %v103_v40 }
  0xd3   :  { %v108_v43 = vsel %vm106_vm10, %v107_v41, %v105_v42  ;;  %vm1338_vm10 = vcmask 23552  }
  0xd4   :  { %v109_v44 = vmax.f32 %v108_v43, 1e-12 }
  0xd6   :  { %2197 = vrcp.f32 %v109_v44 }
  0xe0   :  { %v2198_v45 = vpop.eup %2197 }
  0xe1   :  { %v111_v46 = vmul.f32 5.0, %v2198_v45 }
  0xe3   :  { %v112_v47 = vmin.f32 %v111_v46, 1.0 }
  0xe5   :  { %v113_v48 = vmul.f32 %v112_v47, %v96_v21 }
  0xe7   :  { %1873 = vmatmul.mubr.msk.f32.vlgmr.msra.gmra.mrb[0].mxu0 %vm98_vm7, %v113_v48 }
  0xe8   :  { %2078 = vmatpush3.bf16.msra.mxu0 %v2420_v32  ;;  %1894 = vmatprep.mubr.msk.f32.mxu0 %vm2338_vm8, %v2339_v35 }
  0xe9   :  { %2079 = vmatprep.subr.bf16.mxu0 %v2337_v27 }
  0xec   :  { %2081 = vmatpush3.bf16.msra.mxu0 %v2428_v37 }
  0xed   :  { %2088 = vmatprep.subr.bf16.mxu0 %v2337_v27 }
 0x102   :  { %v269_v49 = vpop.f32.mrb[0].mxu1 }
 0x103   :  { %v1885_v50 = vpop.f32.mrb[1].mxu1 }
 0x1ba   :  { %v196_v52 = vpop.f32.mrb[0].mxu0 }
 0x1bb   :  { %v2451_v53 = vadd.f32 %v1749_v51, %v196_v52  ;;  %v1874_v54 = vpop.f32.mrb[1].mxu0 }
 0x1bd   :  { %v273_v55 = vadd.f32 %v269_v49, %v2451_v53 }
 0x1bf   :  { %2199 = vtanh.f32 %v273_v55  ;;  %v1751_v57 = vmul.f32 -1.442695, %v273_v55 }
 0x1c1   :  { %2201 = vpow2.f32 %v1751_v57 }
 0x1c9   :  { %v2200_v56 = vpop.eup %2199 }
 0x1ca   :  { %283 = vrot.lane.b32.xlu0 %v2200_v56, %s2340_s12 }
 0x1cb   :  { %v2202_v58 = vpop.eup %2201 }
 0x1cc   :  { %v277_v59 = vadd.f32 1.0, %v2202_v58 }
 0x1ce   :  { %2203 = vrcp.f32 %v277_v59 }
 0x1d8   :  { %v2204_v60 = vpop.eup %2203 }
 0x1d9   :  { %v281_v63 = vmul.f32 0.0, %v2204_v60 }
 0x23c   :  { %v284_v61 = vpop.permute.xlu0 %283 }
 0x23d   :  { %v286_v62 = vmul.f32 %v2204_v60, %v284_v61 }
 0x23f   :  { %288 = vrot.lane.b32.xlu1 %v286_v62, %s2341_s13 }
 0x2b1   :  { %v289_v0 = vpop.permute.xlu1 %288 }
 0x2b2   :  { %v291_v1 = vadd.f32 %v289_v0, %v281_v63 }
 0x2b4   :  { %2205 = vtanh.f32 %v291_v1  ;;  %v385_v17 = vrot.slane %v291_v1, 7 }
 0x2be   :  { %v2206_v2 = vpop.eup %2205 }
 0x2bf   :  { %294 = vrot.lane.b32.xlu1 %v2206_v2, %s2340_s12 }
 0x331   :  { %v295_v3 = vpop.permute.xlu1 %294 }
 0x332   :  { %v2457_v4 = vmul.f32 %v2204_v60, %v295_v3 }
 0x334   :  { %299 = vrot.lane.b32.xlu1 %v2457_v4, %s2341_s13 }
 0x3a6   :  { %v300_v5 = vpop.permute.xlu1 %299 }
 0x3a7   :  { %1895 = vmatmul.mubr.msk.f32.vlgmr.msra.gmra.mrb[2].mxu0 %vm98_vm7, %v300_v5 }
 0x3a8   :  { %2090 = vmatpush3.bf16.msra.mxu0 %v2420_v32  ;;  %1916 = vmatprep.mubr.msk.f32.mxu0 %vm2338_vm8, %v2339_v35 }
 0x3a9   :  { %2091 = vmatprep.subr.bf16.mxu0 %v2337_v27 }
 0x3ac   :  { %2093 = vmatpush3.bf16.msra.mxu0 %v2428_v37 }
 0x3ad   :  { %2100 = vmatprep.subr.bf16.mxu0 %v2337_v27 }
 0x47a   :  { %v369_v6 = vpop.f32.mrb[2].mxu0 }
 0x47b   :  { %v374_v7 = vrot.slane %v369_v6, 7  ;;  %v1896_v8 = vpop.f32.mrb[3].mxu0 }
 0x47d   :  { %v376_v9 = vadd.f32 %v374_v7, %v2451_v53 }
 0x47f   :  { %2207 = vtanh.f32 %v376_v9  ;;  %v1753_v11 = vmul.f32 -1.442695, %v376_v9 }
 0x481   :  { %2209 = vpow2.f32 %v1753_v11 }
 0x489   :  { %v2208_v10 = vpop.eup %2207 }
 0x48a   :  { %389 = vrot.lane.b32.xlu1 %v2208_v10, %s2340_s12 }
 0x48b   :  { %v2210_v12 = vpop.eup %2209 }
 0x48c   :  { %v380_v13 = vadd.f32 1.0, %v2210_v12 }
 0x48e   :  { %2211 = vrcp.f32 %v380_v13 }
 0x498   :  { %v2212_v14 = vpop.eup %2211 }
 0x499   :  { %v387_v18 = vmul.f32 %v2212_v14, %v385_v17 }
 0x4fc   :  { %v390_v15 = vpop.permute.xlu1 %389 }
 0x4fd   :  { %v392_v16 = vmul.f32 %v2212_v14, %v390_v15 }
 0x4ff   :  { %394 = vrot.lane.b32.xlu1 %v392_v16, %s2341_s13 }
 0x571   :  { %v395_v19 = vpop.permute.xlu1 %394 }
 0x572   :  { %v397_v20 = vadd.f32 %v395_v19, %v387_v18 }
 0x574   :  { %2213 = vtanh.f32 %v397_v20  ;;  %v492_v41 = vrot.slane %v397_v20, 7 }
 0x57e   :  { %v2214_v21 = vpop.eup %2213 }
 0x57f   :  { %400 = vrot.lane.b32.xlu1 %v2214_v21, %s2340_s12 }
 0x5f1   :  { %v401_v22 = vpop.permute.xlu1 %400 }
 0x5f2   :  { %v403_v23 = vmul.f32 %v2212_v14, %v401_v22 }
 0x5f4   :  { %v405_v24 = vrot.slane %v403_v23, 1  ;;  %v1046_v48 = vsel %vm83_vm0, %v2457_v4, %v403_v23 }
 0x5f6   :  { %406 = vrot.lane.b32.xlu1 %v405_v24, %s2341_s13 }
 0x668   :  { %v407_v25 = vpop.permute.xlu1 %406 }
 0x669   :  { %1906 = vmatmul.mubr.msk.f32.vlgmr.msra.gmra.mrb[2].mxu1 %vm98_vm7, %v407_v25 }
 0x66a   :  { %2096 = vmatpush3.bf16.msra.mxu1 %v2420_v32  ;;  %1927 = vmatprep.mubr.msk.f32.mxu1 %vm2338_vm8, %v2339_v35 }
 0x66b   :  { %2097 = vmatprep.subr.bf16.mxu1 %v2337_v27 }
 0x66e   :  { %2099 = vmatpush3.bf16.msra.mxu1 %v2428_v37 }
 0x66f   :  { %2106 = vmatprep.subr.bf16.mxu1 %v2337_v27 }
 0x73c   :  { %v476_v26 = vpop.f32.mrb[2].mxu1 }
 0x73d   :  { %v481_v28 = vrot.slane %v476_v26, 6  ;;  %v1907_v29 = vpop.f32.mrb[3].mxu1 }
 0x73f   :  { %v483_v30 = vadd.f32 %v481_v28, %v2451_v53 }
 0x741   :  { %2215 = vtanh.f32 %v483_v30  ;;  %v1755_v33 = vmul.f32 -1.442695, %v483_v30 }
 0x743   :  { %2217 = vpow2.f32 %v1755_v33 }
 0x74b   :  { %v2216_v31 = vpop.eup %2215 }
 0x74c   :  { %496 = vrot.lane.b32.xlu0 %v2216_v31, %s2340_s12 }
 0x74d   :  { %v2218_v34 = vpop.eup %2217 }
 0x74e   :  { %v487_v36 = vadd.f32 1.0, %v2218_v34 }
 0x750   :  { %2219 = vrcp.f32 %v487_v36 }
 0x75a   :  { %v2220_v38 = vpop.eup %2219 }
 0x75b   :  { %v494_v42 = vmul.f32 %v2220_v38, %v492_v41 }
 0x7be   :  { %v497_v39 = vpop.permute.xlu0 %496 }
 0x7bf   :  { %v499_v40 = vmul.f32 %v2220_v38, %v497_v39 }
 0x7c1   :  { %501 = vrot.lane.b32.xlu1 %v499_v40, %s2341_s13 }
 0x833   :  { %v502_v43 = vpop.permute.xlu1 %501 }
 0x834   :  { %v504_v44 = vadd.f32 %v502_v43, %v494_v42 }
 0x836   :  { %2221 = vtanh.f32 %v504_v44  ;;  %v599_v0 = vrot.slane %v504_v44, 7 }
 0x840   :  { %v2222_v45 = vpop.eup %2221 }
 0x841   :  { %507 = vrot.lane.b32.xlu0 %v2222_v45, %s2340_s12 }
 0x8b3   :  { %v508_v46 = vpop.permute.xlu0 %507 }
 0x8b4   :  { %v510_v47 = vmul.f32 %v2220_v38, %v508_v46 }
 0x8b6   :  { %v512_v49 = vrot.slane %v510_v47, 2  ;;  %v1047_v50 = vsel %vm85_vm1, %v1046_v48, %v510_v47 }
 0x8b8   :  { %513 = vrot.lane.b32.xlu1 %v512_v49, %s2341_s13 }
 0x92a   :  { %v514_v51 = vpop.permute.xlu1 %513 }
 0x92b   :  { %1917 = vmatmul.mubr.msk.f32.vlgmr.msra.gmra.mrb[4].mxu0 %vm98_vm7, %v514_v51 }
 0x92c   :  { %2102 = vmatpush3.bf16.msra.mxu0 %v2420_v32  ;;  %1938 = vmatprep.mubr.msk.f32.mxu0 %vm2338_vm8, %v2339_v35 }
 0x92d   :  { %2103 = vmatprep.subr.bf16.mxu0 %v2337_v27 }
 0x930   :  { %2105 = vmatpush3.bf16.msra.mxu0 %v2428_v37 }
 0x931   :  { %2112 = vmatprep.subr.bf16.mxu0 %v2337_v27 }
 0x9fe   :  { %v583_v52 = vpop.f32.mrb[4].mxu0 }
 0x9ff   :  { %v588_v54 = vrot.slane %v583_v52, 5  ;;  %v1918_v55 = vpop.f32.mrb[5].mxu0 }
 0xa01   :  { %v590_v56 = vadd.f32 %v588_v54, %v2451_v53 }
 0xa03   :  { %2223 = vtanh.f32 %v590_v56  ;;  %v1757_v58 = vmul.f32 -1.442695, %v590_v56 }
 0xa05   :  { %2225 = vpow2.f32 %v1757_v58 }
 0xa0d   :  { %v2224_v57 = vpop.eup %2223 }
 0xa0e   :  { %603 = vrot.lane.b32.xlu0 %v2224_v57, %s2340_s12 }
 0xa0f   :  { %v2226_v59 = vpop.eup %2225 }
 0xa10   :  { %v594_v60 = vadd.f32 1.0, %v2226_v59 }
 0xa12   :  { %2227 = vrcp.f32 %v594_v60 }
 0xa1c   :  { %v2228_v61 = vpop.eup %2227 }
 0xa1d   :  { %v601_v1 = vmul.f32 %v2228_v61, %v599_v0 }
 0xa80   :  { %v604_v62 = vpop.permute.xlu0 %603 }
 0xa81   :  { %v606_v63 = vmul.f32 %v2228_v61, %v604_v62 }
 0xa83   :  { %608 = vrot.lane.b32.xlu1 %v606_v63, %s2341_s13 }
 0xaf5   :  { %v609_v2 = vpop.permute.xlu1 %608 }
 0xaf6   :  { %v611_v3 = vadd.f32 %v609_v2, %v601_v1 }
 0xaf8   :  { %2229 = vtanh.f32 %v611_v3  ;;  %v706_v21 = vrot.slane %v611_v3, 7 }
 0xb02   :  { %v2230_v4 = vpop.eup %2229 }
 0xb03   :  { %614 = vrot.lane.b32.xlu0 %v2230_v4, %s2340_s12 }
 0xb75   :  { %v615_v5 = vpop.permute.xlu0 %614 }
 0xb76   :  { %v617_v6 = vmul.f32 %v2228_v61, %v615_v5 }
 0xb78   :  { %v619_v7 = vrot.slane %v617_v6, 3  ;;  %v1048_v8 = vsel %vm87_vm2, %v1047_v50, %v617_v6 }
 0xb7a   :  { %620 = vrot.lane.b32.xlu1 %v619_v7, %s2341_s13 }
 0xbec   :  { %v621_v9 = vpop.permute.xlu1 %620 }
 0xbed   :  { %1928 = vmatmul.mubr.msk.f32.vlgmr.msra.gmra.mrb[4].mxu1 %vm98_vm7, %v621_v9 }
 0xbee   :  { %2108 = vmatpush3.bf16.msra.mxu1 %v2420_v32  ;;  %1949 = vmatprep.mubr.msk.f32.mxu1 %vm2338_vm8, %v2339_v35 }
 0xbef   :  { %2109 = vmatprep.subr.bf16.mxu1 %v2337_v27 }
 0xbf2   :  { %2111 = vmatpush3.bf16.msra.mxu1 %v2428_v37 }
 0xbf3   :  { %2118 = vmatprep.subr.bf16.mxu1 %v2337_v27 }
 0xcc0   :  { %v690_v10 = vpop.f32.mrb[4].mxu1 }
 0xcc1   :  { %v695_v11 = vrot.slane %v690_v10, 4  ;;  %v1929_v12 = vpop.f32.mrb[5].mxu1 }
 0xcc3   :  { %v697_v13 = vadd.f32 %v695_v11, %v2451_v53 }
 0xcc5   :  { %2231 = vtanh.f32 %v697_v13  ;;  %v1759_v15 = vmul.f32 -1.442695, %v697_v13 }
 0xcc7   :  { %2233 = vpow2.f32 %v1759_v15 }
 0xccf   :  { %v2232_v14 = vpop.eup %2231 }
 0xcd0   :  { %710 = vrot.lane.b32.xlu0 %v2232_v14, %s2340_s12 }
 0xcd1   :  { %v2234_v16 = vpop.eup %2233 }
 0xcd2   :  { %v701_v17 = vadd.f32 1.0, %v2234_v16 }
 0xcd4   :  { %2235 = vrcp.f32 %v701_v17 }
 0xcde   :  { %v2236_v18 = vpop.eup %2235 }
 0xcdf   :  { %v708_v22 = vmul.f32 %v2236_v18, %v706_v21 }
 0xd42   :  { %v711_v19 = vpop.permute.xlu0 %710 }
 0xd43   :  { %v713_v20 = vmul.f32 %v2236_v18, %v711_v19 }
 0xd45   :  { %715 = vrot.lane.b32.xlu1 %v713_v20, %s2341_s13 }
 0xdb7   :  { %v716_v23 = vpop.permute.xlu1 %715 }
 0xdb8   :  { %v718_v24 = vadd.f32 %v716_v23, %v708_v22 }
 0xdba   :  { %2237 = vtanh.f32 %v718_v24 }
 0xdc4   :  { %v2238_v25 = vpop.eup %2237 }
 0xdc5   :  { %721 = vrot.lane.b32.xlu0 %v2238_v25, %s2340_s12 }
 0xe37   :  { %v722_v26 = vpop.permute.xlu0 %721 }
 0xe38   :  { %v724_v28 = vmul.f32 %v2236_v18, %v722_v26 }
 0xe3a   :  { %v726_v29 = vrot.slane %v724_v28, 4  ;;  %v1049_v30 = vsel %vm89_vm3, %v1048_v8, %v724_v28  ;;  %v1077_v28 = vld [vmem:[#allocation4 + $0x40] sm:$0xff] }
 0xe3c   :  { %727 = vrot.lane.b32.xlu1 %v726_v29, %s2341_s13  ;;  %v1078_v29 = vld [vmem:[#allocation4 + $0x48] sm:$0xff] }
 0xeae   :  { %v728_v31 = vpop.permute.xlu1 %727 }
 0xeaf   :  { %1939 = vmatmul.mubr.msk.f32.vlgmr.msra.gmra.mrb[6].mxu0 %vm98_vm7, %v728_v31  ;;  %v2125_v31 = vpack.c.bf16 %v1078_v29, %v1077_v28 }
 0xeb0   :  { %2114 = vmatpush3.bf16.msra.mxu0 %v2420_v32  ;;  %1960 = vmatprep.mubr.msk.f32.mxu0 %vm2338_vm8, %v2339_v35 }
 0xeb1   :  { %2115 = vmatprep.subr.bf16.mxu0 %v2337_v27 }
 0xeb4   :  { %2117 = vmatpush3.bf16.msra.mxu0 %v2428_v37  ;;  %v813_v37 = vrot.slane %v718_v24, 7 }
 0xeb5   :  { %2124 = vmatprep.subr.bf16.mxu0 %v2337_v27 }
 0xf82   :  { %v797_v33 = vpop.f32.mrb[6].mxu0 }
 0xf83   :  { %v802_v34 = vrot.slane %v797_v33, 3  ;;  %v1940_v36 = vpop.f32.mrb[7].mxu0  ;;  %v1080_v33 = vld [vmem:[#allocation4 + $0x58] sm:$0xff] }
 0xf84   :  { %v1053_v36 = vlaneseq }
 0xf85   :  { %v804_v38 = vadd.f32 %v802_v34, %v2451_v53 }
 0xf87   :  { %2239 = vtanh.f32 %v804_v38  ;;  %v1761_v40 = vmul.f32 -1.442695, %v804_v38  ;;  %v1081_v38 = vld [vmem:[#allocation4 + $0x60] sm:$0xff] }
 0xf89   :  { %2241 = vpow2.f32 %v1761_v40  ;;  %v1083_v40 = vld [vmem:[#allocation4 + $0x70] sm:$0xff] }
 0xf91   :  { %v2240_v39 = vpop.eup %2239 }
 0xf92   :  { %817 = vrot.lane.b32.xlu0 %v2240_v39, %s2340_s12  ;;  %v1082_v39 = vld [vmem:[#allocation4 + $0x68] sm:$0xff] }
 0xf93   :  { %v2242_v32 = vpop.eup %2241 }
 0xf94   :  { %v808_v41 = vadd.f32 1.0, %v2242_v32  ;;  %v2119_v32 = vpack.c.bf16 %v1082_v39, %v1081_v38  ;;  %v1375_v38 = vld [vmem:[#allocation4 + $0x110] sm:$0xff] }
 0xf96   :  { %2243 = vrcp.f32 %v808_v41  ;;  %v1084_v41 = vld [vmem:[#allocation4 + $0x78] sm:$0xff] }
 0xfa0   :  { %v2244_v42 = vpop.eup %2243 }
 0xfa1   :  { %v815_v45 = vmul.f32 %v2244_v42, %v813_v37  ;;  %v1057_v37 = vstv %s2549_s15 }
0x1004   :  { %v818_v43 = vpop.permute.xlu0 %817 }
0x1005   :  { %v820_v44 = vmul.f32 %v2244_v42, %v818_v43  ;;  %v2122_v43 = vpack.c.bf16 %v1084_v41, %v1083_v40 }
0x1007   :  { %822 = vrot.lane.b32.xlu1 %v820_v44, %s2341_s13  ;;  %v1055_v44 = vstv %s2547_s14 }
0x1079   :  { %v823_v46 = vpop.permute.xlu1 %822 }
0x107a   :  { %v825_v47 = vadd.f32 %v823_v46, %v815_v45 }
0x107c   :  { %2245 = vtanh.f32 %v825_v47  ;;  %v920_v2 = vrot.slane %v825_v47, 7  ;;  %v1074_v47 = vstv %s1062_s18 }
0x1086   :  { %v2246_v48 = vpop.eup %2245 }
0x1087   :  { %828 = vrot.lane.b32.xlu0 %v2246_v48, %s2340_s12 }
0x10f9   :  { %v829_v49 = vpop.permute.xlu0 %828 }
0x10fa   :  { %v831_v50 = vmul.f32 %v2244_v42, %v829_v49  ;;  %v2554_v42 = vshrl.u32 %v1053_v36, 7 }
0x10fc   :  { %v833_v51 = vrot.slane %v831_v50, 5  ;;  %v1050_v52 = vsel %vm91_vm4, %v1049_v30, %v831_v50  ;;  %v1079_v30 = vld [vmem:[#allocation4 + $0x50] sm:$0xff]  ;;  %vm1056_vm11 = vcmp.ge.s32.totalorder %v2554_v42, %v1055_v44  ;;  %vm1058_vm12 = vcmp.le.s32.totalorder %v2554_v42, %v1057_v37 }
0x10fd   :  { %v2128_v34 = vpack.c.bf16 %v1080_v33, %v1079_v30  ;;  %vm1059_vm13 = vmand %vm1056_vm11, %vm1058_vm12  ;;  %v2342_v30 = vmov 1   ;;  %v1327_v33 = vand.u32 127, %v1053_v36  ;;  %vm1330_vm0 = vcmp.lt.s32.totalorder %v2554_v42, %v1055_v44 }
0x10fe   :  { %834 = vrot.lane.b32.xlu1 %v833_v51, %s2341_s13  ;;  %vm1334_vm4 = vcmp.gt.s32.totalorder %v2554_v42, %v1057_v37 }
0x10ff   :  { %2191 = vset.pattern.permute.xlu1 %v2342_v30  ;;  %vm1329_vm15 = vcmp.eq.s32.totalorder %v1327_v33, 1  ;;  %vm1328_vm1 = vcmp.eq.s32.totalorder %v1327_v33, 0  ;;  %vm1333_vm3 = vcmp.eq.s32.totalorder %v1327_v33, 2  ;;  %v1374_v33 = vld [vmem:[#allocation4 + $0x108] sm:$0xff] }
0x1100   :  { %vm1331_vm2 = vmand %vm1329_vm15, %vm1330_vm0 }
0x1170   :  { %v835_v54 = vpop.permute.xlu1 %834 }
0x1171   :  { %1950 = vmatmul.mubr.msk.f32.vlgmr.msra.gmra.mrb[6].mxu1 %vm98_vm7, %v835_v54 }
0x1172   :  { %1971 = vmatprep.mubr.msk.f32.mxu1 %vm2338_vm8, %v2339_v35  ;;  %2120 = vmatpush3.bf16.msra.mxu1 %v2119_v32 }
0x1173   :  { %2121 = vmatprep.subr.bf16.mxu1 %v2337_v27 }
0x1176   :  { %2123 = vmatpush3.bf16.msra.mxu1 %v2122_v43 }
0x1177   :  { %2130 = vmatprep.subr.bf16.mxu1 %v2337_v27 }
0x1244   :  { %v904_v55 = vpop.f32.mrb[6].mxu1 }
0x1245   :  { %v909_v56 = vrot.slane %v904_v55, 2  ;;  %v1951_v57 = vpop.f32.mrb[7].mxu1 }
0x1247   :  { %v911_v58 = vadd.f32 %v909_v56, %v2451_v53 }
0x1249   :  { %2247 = vtanh.f32 %v911_v58  ;;  %v1763_v60 = vmul.f32 -1.442695, %v911_v58 }
0x124b   :  { %2249 = vpow2.f32 %v1763_v60 }
0x1253   :  { %v2248_v59 = vpop.eup %2247 }
0x1254   :  { %924 = vrot.lane.b32.xlu0 %v2248_v59, %s2340_s12 }
0x1255   :  { %v2250_v61 = vpop.eup %2249 }
0x1256   :  { %v915_v62 = vadd.f32 1.0, %v2250_v61 }
0x1258   :  { %2251 = vrcp.f32 %v915_v62  ;;  %v1240_v62 = vld [vmem:[#allocation4 + $0x80] sm:$0xff] }
0x1262   :  { %v2252_v63 = vpop.eup %2251 }
0x1263   :  { %v922_v3 = vmul.f32 %v2252_v63, %v920_v2  ;;  %v1243_v2 = vld [vmem:[#allocation4 + $0x98] sm:$0xff] }
0x12c6   :  { %v925_v0 = vpop.permute.xlu0 %924 }
0x12c7   :  { %v927_v1 = vmul.f32 %v2252_v63, %v925_v0 }
0x12c9   :  { %929 = vrot.lane.b32.xlu1 %v927_v1, %s2341_s13  ;;  %v1242_v1 = vld [vmem:[#allocation4 + $0x90] sm:$0xff] }
0x133b   :  { %v930_v4 = vpop.permute.xlu1 %929 }
0x133c   :  { %v932_v5 = vadd.f32 %v930_v4, %v922_v3  ;;  %v2134_v3 = vpack.c.bf16 %v1243_v2, %v1242_v1  ;;  %v1244_v4 = vld [vmem:[#allocation4 + $0xa0] sm:$0xff]  ;;  %v1391_v1 = vld [vmem:[#allocation4 + $0x130] sm:$0xff] }
0x133e   :  { %2253 = vtanh.f32 %v932_v5  ;;  %v1027_v23 = vrot.slane %v932_v5, 7  ;;  %v1245_v5 = vld [vmem:[#allocation4 + $0xa8] sm:$0xff] }
0x1348   :  { %v2254_v6 = vpop.eup %2253 }
0x1349   :  { %935 = vrot.lane.b32.xlu0 %v2254_v6, %s2340_s12  ;;  %v2137_v6 = vpack.c.bf16 %v1245_v5, %v1244_v4 }
0x13bb   :  { %v936_v7 = vpop.permute.xlu0 %935 }
0x13bc   :  { %v938_v8 = vmul.f32 %v2252_v63, %v936_v7  ;;  %v1241_v63 = vld [vmem:[#allocation4 + $0x88] sm:$0xff]  ;;  %v1246_v7 = vld [vmem:[#allocation4 + $0xb0] sm:$0xff] }
0x13bd   :  { %v2131_v0 = vpack.c.bf16 %v1241_v63, %v1240_v62  ;;  %v2344_v62 = vmov 2   ;;  %v1389_v63 = vld [vmem:[#allocation4 + $0x120] sm:$0xff] }
0x13be   :  { %v940_v9 = vrot.slane %v938_v8, 6  ;;  %v2535_v10 = vsel %vm93_vm5, %v1050_v52, %v938_v8  ;;  %v1247_v8 = vld [vmem:[#allocation4 + $0xb8] sm:$0xff]  ;;  %vm2596_vm5 = vmor %vm1328_vm1, %vm1331_vm2 }
0x13c0   :  { %941 = vrot.lane.b32.xlu1 %v940_v9, %s2341_s13  ;;  %v2140_v9 = vpack.c.bf16 %v1247_v8, %v1246_v7 }
0x1432   :  { %v942_v11 = vpop.permute.xlu1 %941 }
0x1433   :  { %1961 = vmatmul.mubr.msk.f32.vlgmr.msra.gmra.mrb[8].mxu0 %vm98_vm7, %v942_v11  ;;  %v1249_v11 = vld [vmem:[#allocation4 + $0xc8] sm:$0xff] }
0x1434   :  { %1982 = vmatprep.mubr.msk.f32.mxu0 %vm2338_vm8, %v2339_v35  ;;  %2126 = vmatpush3.bf16.msra.mxu0 %v2125_v31  ;;  %v2343_v31 = vmov 0  }
0x1435   :  { %2127 = vmatprep.subr.bf16.mxu0 %v2337_v27  ;;  %2192 = vset.pattern.permute.xlu0 %v2343_v31  ;;  %v1373_v31 = vld [vmem:[#allocation4 + $0x100] sm:$0xff] }
0x1438   :  { %2129 = vmatpush3.bf16.msra.mxu0 %v2128_v34  ;;  %v2161_v34 = vpack.c.bf16 %v1374_v33, %v1373_v31 }
0x1439   :  { %2154 = vmatprep.subr.bf16.mxu0 %v2337_v27 }
0x1506   :  { %v1011_v12 = vpop.f32.mrb[8].mxu0 }
0x1507   :  { %v1016_v13 = vrot.slane %v1011_v12, 1  ;;  %v1962_v14 = vpop.f32.mrb[9].mxu0 }
0x1508   :  { %v1251_v14 = vld [vmem:[#allocation4 + $0xd8] sm:$0xff] }
0x1509   :  { %v1018_v15 = vadd.f32 %v1016_v13, %v2451_v53  ;;  %v1250_v13 = vld [vmem:[#allocation4 + $0xd0] sm:$0xff] }
0x150b   :  { %2255 = vtanh.f32 %v1018_v15  ;;  %v1765_v17 = vmul.f32 -1.442695, %v1018_v15  ;;  %v2146_v15 = vpack.c.bf16 %v1251_v14, %v1250_v13 }
0x150d   :  { %2257 = vpow2.f32 %v1765_v17  ;;  %v1253_v17 = vld [vmem:[#allocation4 + $0xe8] sm:$0xff] }
0x1515   :  { %v2256_v16 = vpop.eup %2255 }
0x1516   :  { %1031 = vrot.lane.b32.xlu0 %v2256_v16, %s2340_s12  ;;  %v1252_v16 = vld [vmem:[#allocation4 + $0xe0] sm:$0xff] }
0x1517   :  { %v2258_v18 = vpop.eup %2257 }
0x1518   :  { %v1022_v19 = vadd.f32 1.0, %v2258_v18  ;;  %v2149_v18 = vpack.c.bf16 %v1253_v17, %v1252_v16 }
0x151a   :  { %2259 = vrcp.f32 %v1022_v19  ;;  %v1254_v19 = vld [vmem:[#allocation4 + $0xf0] sm:$0xff] }
0x1524   :  { %v2260_v20 = vpop.eup %2259 }
0x1525   :  { %v1029_v24 = vmul.f32 %v2260_v20, %v1027_v23 }
0x1588   :  { %v1032_v21 = vpop.permute.xlu0 %1031 }
0x1589   :  { %v1034_v22 = vmul.f32 %v2260_v20, %v1032_v21 }
0x158b   :  { %1036 = vrot.lane.b32.xlu1 %v1034_v22, %s2341_s13 }
0x15fd   :  { %v1037_v25 = vpop.permute.xlu1 %1036 }
0x15fe   :  { %v1039_v26 = vadd.f32 %v1037_v25, %v1029_v24  ;;  %v1162_v24 = vsub.s32 0, %v2554_v42 }
0x1600   :  { %2261 = vtanh.f32 %v1039_v26 }
0x1601   :  { %2263 = vrcp.f32 %v1074_v47 }
0x160a   :  { %v2262_v53 = vpop.eup %2261 }
0x160b   :  { %1042 = vrot.lane.b32.xlu0 %v2262_v53, %s2340_s12  ;;  %v2264_v57 = vpop.eup %2263 }
0x167d   :  { %v1043_v45 = vpop.permute.xlu0 %1042 }
0x167e   :  { %v1045_v46 = vmul.f32 %v2260_v20, %v1043_v45  ;;  %v1255_v20 = vld [vmem:[#allocation4 + $0xf8] sm:$0xff] }
0x167f   :  { %v2152_v21 = vpack.c.bf16 %v1255_v20, %v1254_v19 }
0x1680   :  { %v2568_v48 = vsel %vm95_vm6, %v2535_v10, %v1045_v46  ;;  %v1248_v10 = vld [vmem:[#allocation4 + $0xc0] sm:$0xff]  ;;  %vm2600_vm6 = vmand %vm1333_vm3, %vm1334_vm4 }
0x1681   :  { %v1065_v49 = vsel %vm1059_vm13, %v2568_v48, 0.0  ;;  %1165 = vrot.lane.b32.xlu0 %v2568_v48, %s2341_s13  ;;  %v2143_v12 = vpack.c.bf16 %v1249_v11, %v1248_v10  ;;  %vm1336_vm9 = vmor %vm2596_vm5, %vm2600_vm6 }
0x1682   :  { %v1067_v50 = vsel %vm1066_vm14, %v1065_v49, 0.0 }
0x1683   :  { %v1068_v51 = vrot.slane %v1067_v50, 4 }
0x1685   :  { %v1069_v52 = vadd.f32 %v1068_v51, %v1067_v50 }
0x1687   :  { %v1070_v54 = vrot.slane %v1069_v52, 2 }
0x1689   :  { %v1071_v55 = vadd.f32 %v1070_v54, %v1069_v52 }
0x168b   :  { %v1072_v56 = vrot.slane %v1071_v55, 1 }
0x168d   :  { %v1073_v58 = vadd.f32 %v1072_v56, %v1071_v55 }
0x168f   :  { %v1076_v59 = vmul.f32 %v2264_v57, %v1073_v58 }
0x1691   :  { %1086 = vrot.lane.b32.xlu1 %v1076_v59, %s2341_s13 }
0x16f3   :  { %v1166_v60 = vpop.permute.xlu0 %1165 }
0x16f4   :  { %1983 = vmatmul.mubr.msk.f32.vlgmr.msra.gmra.mrb[10].mxu0 %vm98_vm7, %v1166_v60 }
0x16f5   :  { %2028 = vmatprep.mubr.msk.f32.mxu0 %vm2338_vm8, %v2339_v35 }
0x1703   :  { %v1087_v61 = vpop.permute.xlu1 %1086 }
0x1704   :  { %1972 = vmatmul.mubr.msk.f32.vlgmr.msra.gmra.mrb[8].mxu1 %vm98_vm7, %v1087_v61 }
0x1705   :  { %2017 = vmatprep.mubr.msk.f32.mxu1 %vm2338_vm8, %v2339_v35  ;;  %2132 = vmatpush3.bf16.msra.mxu1 %v2131_v0  ;;  %v1390_v0 = vld [vmem:[#allocation4 + $0x128] sm:$0xff] }
0x1706   :  { %2133 = vmatprep.subr.bf16.mxu1 %v2337_v27  ;;  %v2155_v2 = vpack.c.bf16 %v1390_v0, %v1389_v63 }
0x1708   :  { %2156 = vmatpush3.bf16.msra.mxu0 %v2155_v2 }
0x1709   :  { %2135 = vmatpush3.bf16.msra.mxu1 %v2134_v3  ;;  %v1392_v3 = vld [vmem:[#allocation4 + $0x138] sm:$0xff]  ;;  %2157 = vmatprep.subr.bf16.mxu0 %v2337_v27 }
0x170a   :  { %2136 = vmatprep.subr.bf16.mxu1 %v2337_v27  ;;  %v2158_v4 = vpack.c.bf16 %v1392_v3, %v1391_v1 }
0x170c   :  { %2159 = vmatpush3.bf16.msra.mxu0 %v2158_v4 }
0x170d   :  { %2138 = vmatpush3.bf16.msra.mxu1 %v2137_v6  ;;  %2160 = vmatprep.subr.bf16.mxu0 %v2337_v27 }
0x170e   :  { %2139 = vmatprep.subr.bf16.mxu1 %v2337_v27 }
0x1711   :  { %2141 = vmatpush3.bf16.msra.mxu1 %v2140_v9 }
0x1712   :  { %2142 = vmatprep.subr.bf16.mxu1 %v2337_v27 }
0x1715   :  { %2144 = vmatpush3.bf16.msra.mxu1 %v2143_v12 }
0x1716   :  { %2145 = vmatprep.subr.bf16.mxu1 %v2337_v27 }
0x1719   :  { %2147 = vmatpush3.bf16.msra.mxu1 %v2146_v15 }
0x171a   :  { %2148 = vmatprep.subr.bf16.mxu1 %v2337_v27 }
0x171d   :  { %2150 = vmatpush3.bf16.msra.mxu1 %v2149_v18 }
0x171e   :  { %2151 = vmatprep.subr.bf16.mxu1 %v2337_v27 }
0x1721   :  { %2153 = vmatpush3.bf16.msra.mxu1 %v2152_v21 }
0x17c7   :  { %v1235_v22 = vpop.f32.mrb[10].mxu0 }
0x17c8   :  { %v1984_v23 = vpop.f32.mrb[11].mxu0 }
0x17d7   :  { %v1156_v25 = vpop.f32.mrb[8].mxu1 }
0x17d8   :  { %v1163_v26 = vrot.slane %v1156_v25, %v1162_v24  ;;  %v1973_v53 = vpop.f32.mrb[9].mxu1 }
0x17da   :  { %v1236_v28 = vadd.f32 %v1235_v22, %v1163_v26 }
0x17dc   :  { %2265 = vtanh.f32 %v1236_v28 }
0x17e6   :  { %v2266_v29 = vpop.eup %2265 }
0x17e7   :  { %2018 = vmatmul.mubr.f32.vlgmr.msra.gmra.mrb[10].mxu1 %v2266_v29 }
0x18ba   :  { %v1322_v36 = vpop.f32.mrb[10].mxu1 }
0x18bb   :  { %v1337_v39 = vsel %vm1336_vm9, %v1322_v36, -1e+30  ;;  %v2019_v40 = vpop.f32.mrb[11].mxu1  ;;  %v1376_v36 = vld [vmem:[#allocation4 + $0x118] sm:$0xff] }
0x18bc   :  { %v1339_v32 = vsel %vm1338_vm10, %v1337_v39, -inf  ;;  %v2164_v40 = vpack.c.bf16 %v1376_v36, %v1375_v38 }
0x18bd   :  { %v1340_v41 = vrot.slane %v1339_v32, 4 }
0x18bf   :  { %v1341_v42 = vmax.f32 %v1339_v32, %v1340_v41  ;;  %v1555_v32 = vld [vmem:[#allocation4 + $0x140] sm:$0xff]  ;;  %v1556_v41 = vld [vmem:[#allocation4 + $0x148] sm:$0xff] }
0x18c1   :  { %v1342_v43 = vrot.slane %v1341_v42, 2 }
0x18c3   :  { %v1343_v44 = vmax.f32 %v1341_v42, %v1342_v43  ;;  %v2167_v42 = vpack.c.bf16 %v1556_v41, %v1555_v32  ;;  %v1557_v43 = vld [vmem:[#allocation4 + $0x150] sm:$0xff] }
0x18c5   :  { %v1344_v37 = vrot.slane %v1343_v44, 1 }
0x18c7   :  { %v1345_v45 = vmax.f32 %v1343_v44, %v1344_v37  ;;  %v1558_v44 = vld [vmem:[#allocation4 + $0x158] sm:$0xff] }
0x18c9   :  { %v1346_v46 = vsub.f32 %v1337_v39, %v1345_v45  ;;  %v2170_v45 = vpack.c.bf16 %v1558_v44, %v1557_v43 }
0x18cb   :  { %v1347_v47 = vmul.f32 1.442695, %v1346_v46 }
0x18cd   :  { %2267 = vpow2.f32 %v1347_v47  ;;  %v1637_v47 = vld [vmem:[#allocation4 + $0x160] sm:$0xff] }
0x18d7   :  { %v2268_v49 = vpop.eup %2267 }
0x18d8   :  { %v1349_v50 = vsel %vm1336_vm9, %v2268_v49, 0.0  ;;  %v1638_v49 = vld [vmem:[#allocation4 + $0x168] sm:$0xff] }
0x18d9   :  { %v1350_v51 = vsel %vm1338_vm10, %v1349_v50, 0.0 }
0x18da   :  { %v1351_v52 = vrot.slane %v1350_v51, 4 }
0x18dc   :  { %v1352_v54 = vadd.f32 %v1351_v52, %v1350_v51  ;;  %v1639_v51 = vld [vmem:[#allocation4 + $0x170] sm:$0xff]  ;;  %v1640_v52 = vld [vmem:[#allocation4 + $0x178] sm:$0xff] }
0x18de   :  { %v1353_v55 = vrot.slane %v1352_v54, 2 }
0x18e0   :  { %v1354_v56 = vadd.f32 %v1353_v55, %v1352_v54  ;;  %v2176_v54 = vpack.c.bf16 %v1640_v52, %v1639_v51 }
0x18e2   :  { %v1355_v57 = vrot.slane %v1354_v56, 1 }
0x18e4   :  { %v1356_v58 = vadd.f32 %v1355_v57, %v1354_v56 }
0x18e6   :  { %v1357_v59 = vmax.f32 %v1356_v58, 1e-30 }
0x18e8   :  { %2269 = vrcp.f32 %v1357_v59 }
0x18f2   :  { %v2270_v60 = vpop.eup %2269 }
0x18f3   :  { %v1359_v61 = vmul.f32 %v2270_v60, %v1349_v50  ;;  %v2173_v50 = vpack.c.bf16 %v1638_v49, %v1637_v47 }
0x18f5   :  { %1362 = vperm.xlu0 %2192, %v1359_v61   ;;  %1378 = vperm.xlu1 %2191, %v1359_v61  }
0x18f9   :  { %2193 = vset.pattern.permute.xlu1 %v2344_v62  ;;  %2194 = vset.pattern.permute.xlu0 %v2344_v62 }
0x18fa   :  { %1544 = vperm.xlu1 %2193, %v1359_v61  }
0x1974   :  { %v1363_v5 = vpop.permute.xlu0 %1362  ;;  %v1379_v6 = vpop.permute.xlu1 %1378 }
0x1975   :  { %v1365_v7 = vmul.f32 %v1363_v5, %v2568_v48  ;;  %v1381_v8 = vmul.f32 %v1379_v6, %v2568_v48 }
0x1977   :  { %v1366_v9 = vsel %vm1066_vm14, %v1365_v7, 0.0  ;;  %v1382_v10 = vsel %vm1066_vm14, %v1381_v8, 0.0 }
0x1978   :  { %v1367_v11 = vrot.slane %v1366_v9, 4  ;;  %v1383_v12 = vrot.slane %v1382_v10, 4 }
0x1979   :  { %v1545_v13 = vpop.permute.xlu1 %1544 }
0x197a   :  { %v1368_v14 = vadd.f32 %v1367_v11, %v1366_v9  ;;  %v1384_v15 = vadd.f32 %v1383_v12, %v1382_v10  ;;  %v1547_v16 = vmul.f32 %v1545_v13, %v2568_v48 }
0x197c   :  { %v1369_v17 = vrot.slane %v1368_v14, 2  ;;  %v1385_v18 = vrot.slane %v1384_v15, 2  ;;  %v1548_v19 = vsel %vm1066_vm14, %v1547_v16, 0.0 }
0x197d   :  { %v1549_v20 = vrot.slane %v1548_v19, 4 }
0x197e   :  { %v1370_v21 = vadd.f32 %v1369_v17, %v1368_v14  ;;  %v1386_v22 = vadd.f32 %v1385_v18, %v1384_v15 }
0x197f   :  { %v1550_v23 = vadd.f32 %v1549_v20, %v1548_v19 }
0x1980   :  { %v1371_v24 = vrot.slane %v1370_v21, 1  ;;  %v1387_v25 = vrot.slane %v1386_v22, 1 }
0x1981   :  { %v1551_v26 = vrot.slane %v1550_v23, 2 }
0x1982   :  { %v1372_v53 = vadd.f32 %v1371_v24, %v1370_v21  ;;  %v1388_v28 = vadd.f32 %v1387_v25, %v1386_v22 }
0x1983   :  { %v1552_v29 = vadd.f32 %v1551_v26, %v1550_v23 }
0x1984   :  { %1469 = vrot.lane.b32.xlu0 %v1372_v53, %s2341_s13  ;;  %1394 = vrot.lane.b32.xlu1 %v1388_v28, %s2341_s13 }
0x1985   :  { %v1553_v30 = vrot.slane %v1552_v29, 1 }
0x1987   :  { %v1554_v48 = vadd.f32 %v1553_v30, %v1552_v29 }
0x1989   :  { %1560 = vrot.lane.b32.xlu1 %v1554_v48, %s2341_s13 }
0x19f6   :  { %v1395_v39 = vpop.permute.xlu1 %1394  ;;  %v1470_v37 = vpop.permute.xlu0 %1469 }
0x19f7   :  { %2029 = vmatmul.mubr.msk.f32.vlgmr.msra.gmra.mrb[12].mxu0 %vm98_vm7, %v1395_v39 }
0x19f8   :  { %2162 = vmatpush3.bf16.msra.mxu0 %v2161_v34  ;;  %2039 = vmatprep.mubr.msk.f32.mxu0 %vm2338_vm8, %v2339_v35 }
0x19f9   :  { %2163 = vmatprep.subr.bf16.mxu0 %v2337_v27 }
0x19fb   :  { %v1561_v46 = vpop.permute.xlu1 %1560 }
0x19fc   :  { %2165 = vmatpush3.bf16.msra.mxu0 %v2164_v40 }
0x19fd   :  { %2166 = vmatprep.subr.bf16.mxu0 %v2337_v27 }
0x19ff   :  { %2040 = vmatmul.mubr.msk.f32.vlgmr.msra.gmra.mrb[14].mxu0 %vm98_vm7, %v1470_v37 }
0x1a00   :  { %2168 = vmatpush3.bf16.msra.mxu0 %v2167_v42  ;;  %2050 = vmatprep.mubr.msk.f32.mxu0 %vm2338_vm8, %v2339_v35 }
0x1a01   :  { %2169 = vmatprep.subr.bf16.mxu0 %v2337_v27 }
0x1a04   :  { %2171 = vmatpush3.bf16.msra.mxu0 %v2170_v45 }
0x1a05   :  { %2172 = vmatprep.subr.bf16.mxu0 %v2337_v27 }
0x1a07   :  { %2051 = vmatmul.mubr.msk.f32.vlgmr.msra.gmra.mrb[16].mxu0 %vm98_vm7, %v1561_v46 }
0x1a08   :  { %2061 = vmatprep.mubr.msk.f32.mxu0 %vm2338_vm8, %v2339_v35  ;;  %2174 = vmatpush3.bf16.msra.mxu0 %v2173_v50  ;;  %v1635_v35 = vld [vmem:[%s2667_s3 + $0x1] sm:$0x1]  ;;  %vm1715_vm8 = vcmask 16384  }
0x1a09   :  { %2175 = vmatprep.subr.bf16.mxu0 %v2337_v27  ;;  %v1641_v27 = vld [vmem:[%s2667_s3 + $0x2] sm:$0x1] }
0x1a0c   :  { %2177 = vmatpush3.bf16.msra.mxu0 %v2176_v54 }
0x1aca   :  { %v1464_v55 = vpop.f32.mrb[12].mxu0 }
0x1acb   :  { %v2030_v56 = vpop.f32.mrb[13].mxu0 }
0x1ad2   :  { %v1539_v57 = vpop.f32.mrb[14].mxu0 }
0x1ad3   :  { %v1540_v58 = vadd.f32 %v1539_v57, %v1464_v55  ;;  %v2041_v59 = vpop.f32.mrb[15].mxu0 }
0x1ada   :  { %v1630_v60 = vpop.f32.mrb[16].mxu0 }
0x1adb   :  { %v1634_v61 = vadd.f32 %v1630_v60, %v1540_v58  ;;  %v2052_v62 = vpop.f32.mrb[17].mxu0 }
0x1add   :  { %v1636_v63 = vadd.f32 %v1635_v35, %v1634_v61 }
0x1adf   :  { %2062 = vmatmul.mubr.msk.f32.vlgmr.msra.gmra.mrb[18].mxu0 %vm98_vm7, %v1636_v63 }
0x1bb2   :  { %v1711_v0 = vpop.f32.mrb[18].mxu0 }
0x1bb3   :  { %v1712_v1 = vadd.f32 %v1711_v0, %v1641_v27  ;;  %v2063_v2 = vpop.f32.mrb[19].mxu0 }
0x1bb5   :  { %1716 = vst.msk [vmem:[#allocation7] sm:$0x1] %vm1715_vm8, %v1712_v1 }
0x1bb6   :  { %2316 = shalt.err (!%p2313_p3)
}
0x1bb7   :  { %s2317_s3 = scalar_lea.hbm %s2668_s4, 16 }
0x1bb8   :  { %p2318_p4 = scmp.ne.s32.totalorder %s2668_s4, %s2317_s3  ;;  %p2321_p5 = scmp.lt.u32.totalorder %s2317_s3, %s2668_s4 }
0x1bba   :  { %p2323_p6 = pnand %p2321_p5, %p2318_p4 }
0x1bbc   :  { %2326 = shalt.err (!%p2323_p6)
}
0x1bbd   :  { %1726 = dma.vmem_to_hbm [thread:$0]  %s1724_s0, 16, %s2668_s4, [#allocation6]  }
0x1bbe   :  { %2331 = dma.done.wait [#allocation6], 16  }
0x1bbf   :  { %2332 = vsyncadd [#allocation6], 4294967280 }
0x1bc0   :  { %1730 = vsyncpa [#allocation5], 1 }
0x1bc1   :  { %1731 = vsyncpa [#allocation6], 1 }

</bundles_post_ra>
